<compile_context>
chip_gen: v6e
topology: v6e:2x2x1
jax: 0.10.0
libtpu: 0.0.40
codegen_flags: <defaults>
</compile_context>

<pallas_src>
import functools
import math

import jax
import jax.numpy as jnp
from jax import lax
from jax.experimental import pallas as pl
from jax.experimental.pallas import tpu as pltpu


def _round_up(n, m):
    return ((n + m - 1) // m) * m


def _flash_attn_kernel(xq_ref, xkv_ref, wq_ref, wkv_ref, o_ref,
                       q_scr, m_scr, l_scr, acc_scr, *, scale, d_pad):
    """One (query-tile, kv-tile) grid step of fused projection + flash attention.

    xq_ref  : (bq, d_in_p)       query-side rows of x
    xkv_ref : (bk, d_in_p)       key/value-side rows of x
    wq_ref  : (d_in_p, d_pad)    zero-padded W_query
    wkv_ref : (d_in_p, 2*d_pad)  zero-padded [W_key | W_value] (fused K/V projection)
    o_ref   : (bq, d_pad)        lane-dense output tile (caller slices back to d_out)
    """
    ki = pl.program_id(1)
    f32 = jnp.float32

    # Trace-time (static) choices keyed off the model dtype.
    is_bf16 = o_ref.dtype == jnp.bfloat16
    # Full f32 contraction for f32 models so results match an exact reference;
    # native bf16 MXU path when the model itself is bf16.
    mm_prec = lax.Precision.DEFAULT if is_bf16 else lax.Precision.HIGHEST
    pv_dtype = jnp.bfloat16 if is_bf16 else f32

    @pl.when(ki == 0)
    def _init():
        # Q projection once per query tile; fold 1/sqrt(d_out) into Q
        # (bq*d_pad VPU muls instead of bq*bk muls on the scores).
        q = jnp.dot(xq_ref[...], wq_ref[...],
                    preferred_element_type=f32, precision=mm_prec)
        q_scr[...] = q * scale
        m_scr[...] = jnp.full_like(m_scr, -jnp.inf)
        l_scr[...] = jnp.zeros_like(l_scr)
        acc_scr[...] = jnp.zeros_like(acc_scr)

    # Fused K/V projection: one MXU push with a 2*d_pad-wide RHS.
    kv = jnp.dot(xkv_ref[...], wkv_ref[...],
                 preferred_element_type=f32, precision=mm_prec)
    k = kv[:, :d_pad]        # tile-aligned static slices (d_pad is a multiple of 128)
    v = kv[:, d_pad:]

    # scores = Q @ K^T without an explicit .T (contract last dims of both on the MXU).
    s = lax.dot_general(q_scr[...], k,
                        dimension_numbers=(((1,), (1,)), ((), ())),
                        preferred_element_type=f32, precision=mm_prec)

    # Online (flash) softmax update.
    m_prev = m_scr[...]
    m_new = jnp.maximum(m_prev, jnp.max(s, axis=-1, keepdims=True))
    alpha = jnp.exp(m_prev - m_new)
    p = jnp.exp(s - m_new)
    l_scr[...] = alpha * l_scr[...] + jnp.sum(p, axis=-1, keepdims=True)
    acc_scr[...] = alpha * acc_scr[...] + jnp.dot(
        p.astype(pv_dtype), v.astype(pv_dtype),
        preferred_element_type=f32, precision=mm_prec)
    m_scr[...] = m_new

    @pl.when(ki == pl.num_programs(1) - 1)
    def _finalize():
        # Exact normalization (runs once per q tile -> negligible cost, keeps f32 accuracy).
        o_ref[...] = (acc_scr[...] / l_scr[...]).astype(o_ref.dtype)


def self_attention_v1(x, w_query, w_key, w_value):
    """Pallas TPU forward matching SelfAttention_v1: x (S, d_in) -> (S, d_out)."""
    S, d_in = x.shape
    d_out = w_query.shape[1]
    assert w_key.shape == (d_in, d_out) and w_value.shape == (d_in, d_out)
    scale = 1.0 / math.sqrt(d_out)   # module divides scores by keys.shape[-1] ** 0.5

    # Lane-dense zero padding of feature dims (zero rows/cols change nothing numerically).
    d_in_p = _round_up(d_in, 128)
    d_out_p = _round_up(d_out, 128)

    xp = jnp.pad(x, ((0, 0), (0, d_in_p - d_in)))
    pad_w = lambda w: jnp.pad(w, ((0, d_in_p - d_in), (0, d_out_p - d_out)))
    wq_p = pad_w(w_query)
    wkv_p = jnp.concatenate([pad_w(w_key), pad_w(w_value)], axis=1)  # (d_in_p, 2*d_out_p)

    # Tile sizes: whole sequence if it fits one 128-row tile, else 128-row tiles.
    if S <= 128:
        bq = bk = S
    else:
        bq = bk = 128
        # TODO(synk): pad + mask ragged sequence lengths instead of asserting divisibility.
        assert S % 128 == 0, "seq_len > 128 must be a multiple of 128"

    grid = (S // bq, S // bk)
    kernel = functools.partial(_flash_attn_kernel, scale=scale, d_pad=d_out_p)

    out_padded = pl.pallas_call(
        kernel,
        out_shape=jax.ShapeDtypeStruct((S, d_out_p), x.dtype),
        grid_spec=pltpu.PrefetchScalarGridSpec(
            num_scalar_prefetch=0,
            grid=grid,
            in_specs=[
                pl.BlockSpec((bq, d_in_p), lambda qi, ki: (qi, 0)),          # x rows -> Q
                pl.BlockSpec((bk, d_in_p), lambda qi, ki: (ki, 0)),          # x rows -> K/V
                pl.BlockSpec((d_in_p, d_out_p), lambda qi, ki: (0, 0)),      # W_q
                pl.BlockSpec((d_in_p, 2 * d_out_p), lambda qi, ki: (0, 0)),  # [W_k | W_v]
            ],
            out_specs=pl.BlockSpec((bq, d_out_p), lambda qi, ki: (qi, 0)),
            scratch_shapes=[
                pltpu.VMEM((bq, d_out_p), jnp.float32),  # scaled Q tile
                pltpu.VMEM((bq, 1), jnp.float32),        # running max m
                pltpu.VMEM((bq, 1), jnp.float32),        # running sum l
                pltpu.VMEM((bq, d_out_p), jnp.float32),  # output accumulator
            ],
        ),
        compiler_params=pltpu.CompilerParams(
            # q-tile axis shardable across TensorCores (megacore);
            # kv axis is the online-softmax reduction -> arbitrary, kept last.
            dimension_semantics=("parallel", "arbitrary")),
    )(xp, xp, wq_p, wkv_p)

    return out_padded[:, :d_out]


def self_attention_ref(x, w_query, w_key, w_value):
    """Pure-JAX reference mirroring the PyTorch forward (full f32 matmul precision)."""
    hp = lax.Precision.HIGHEST
    keys = jnp.dot(x, w_key, precision=hp)
    queries = jnp.dot(x, w_query, precision=hp)
    values = jnp.dot(x, w_value, precision=hp)
    scores = jnp.dot(queries, keys.T, precision=hp)
    weights = jax.nn.softmax(
        scores / jnp.sqrt(jnp.asarray(keys.shape[-1], x.dtype)), axis=-1)
    return jnp.dot(weights, values, precision=hp)


if __name__ == "__main__":
    # --- Test 1: module-native toy shapes (S=8, d_in=32, d_out=16), grid (1,1) ---
    seq_len, d_in, d_out = 8, 32, 16
    key = jax.random.PRNGKey(0)
    kx, kq, kk, kv = jax.random.split(key, 4)
    x = jax.random.normal(kx, (seq_len, d_in), dtype=jnp.float32)
    w_query = jax.random.uniform(kq, (d_in, d_out), dtype=jnp.float32)  # torch.rand -> U[0,1)
    w_key = jax.random.uniform(kk, (d_in, d_out), dtype=jnp.float32)
    w_value = jax.random.uniform(kv, (d_in, d_out), dtype=jnp.float32)

    out = jax.block_until_ready(self_attention_v1(x, w_query, w_key, w_value))
    ref = self_attention_ref(x, w_query, w_key, w_value)
    assert out.shape == (seq_len, d_out)
    assert jnp.allclose(out, ref, atol=1e-2, rtol=1e-2), "mismatch vs reference (small)"

    # --- Test 2: exercises the tiled flash path (grid 2x2) and online-softmax accumulators ---
    S2, di2, do2 = 256, 64, 32
    k2 = jax.random.split(jax.random.PRNGKey(0), 4)
    x2 = jax.random.normal(k2[0], (S2, di2), dtype=jnp.float32)
    wq2 = jax.random.uniform(k2[1], (di2, do2), dtype=jnp.float32)
    wk2 = jax.random.uniform(k2[2], (di2, do2), dtype=jnp.float32)
    wv2 = jax.random.uniform(k2[3], (di2, do2), dtype=jnp.float32)
    out2 = jax.block_until_ready(self_attention_v1(x2, wq2, wk2, wv2))
    ref2 = self_attention_ref(x2, wq2, wk2, wv2)
    assert out2.shape == (S2, do2)
    assert jnp.allclose(out2, ref2, atol=1e-2, rtol=1e-2), "mismatch vs reference (tiled)"

    print("KERNEL_OK")
</pallas_src>

<mosaic_0001>
module attributes {stable_mosaic.version = 11 : i64} {
  func.func @_flash_attn_kernel(%arg0: i32, %arg1: i32, %arg2: memref<8x128xf32, #tpu.memory_space<vmem>>, %arg3: memref<8x128xf32, #tpu.memory_space<vmem>>, %arg4: memref<128x128xf32, #tpu.memory_space<vmem>>, %arg5: memref<128x256xf32, #tpu.memory_space<vmem>>, %arg6: memref<8x128xf32, #tpu.memory_space<vmem>>, %arg7: memref<8x128xf32, #tpu.memory_space<vmem>>, %arg8: memref<8x1xf32, #tpu.memory_space<vmem>>, %arg9: memref<8x1xf32, #tpu.memory_space<vmem>>, %arg10: memref<8x128xf32, #tpu.memory_space<vmem>>) attributes {dimension_semantics = [#tpu.dimension_semantics<parallel>, #tpu.dimension_semantics<arbitrary>], iteration_bounds = array<i64: 1, 1>, scalar_prefetch = 0 : i64, scratch_operands = 4 : i64, tpu.core_type = #tpu.core_type<tc>, window_params = [{transform_indices = @transform_0, window_bounds = array<i64: 8, 128>}, {transform_indices = @transform_1, window_bounds = array<i64: 8, 128>}, {pipeline_mode = #tpu.pipeline_mode<synchronous>, transform_indices = @transform_2, window_bounds = array<i64: 128, 128>}, {pipeline_mode = #tpu.pipeline_mode<synchronous>, transform_indices = @transform_3, window_bounds = array<i64: 128, 256>}, {transform_indices = @transform_4, window_bounds = array<i64: 8, 128>}]} {
    %c0_i32 = arith.constant 0 : i32
    %0 = arith.cmpi eq, %arg1, %c0_i32 : i32
    %1 = arith.extui %0 : i1 to i32
    %c0_i32_0 = arith.constant 0 : i32
    %2 = arith.cmpi ne, %1, %c0_i32_0 : i32
    scf.if %2 {
      %c0_24 = arith.constant 0 : index
      %c0_25 = arith.constant 0 : index
      %35 = vector.load %arg2[%c0_24, %c0_25] : memref<8x128xf32, #tpu.memory_space<vmem>>, vector<8x128xf32>
      %c0_26 = arith.constant 0 : index
      %c0_27 = arith.constant 0 : index
      %36 = vector.load %arg4[%c0_26, %c0_27] : memref<128x128xf32, #tpu.memory_space<vmem>>, vector<128x128xf32>
      %cst_28 = arith.constant dense<0.000000e+00> : vector<8x128xf32>
      %37 = tpu.matmul %35, %36, %cst_28 {dimension_numbers = #tpu.dot_dimension_numbers<[1], [0], [0], [1], [0, 0, 1, 1], [], []>, precision = #tpu.contract_precision<fp32>} : vector<8x128xf32>, vector<128x128xf32>, vector<8x128xf32> -> vector<8x128xf32>
      %cst_29 = arith.constant 2.500000e-01 : f32
      %38 = vector.broadcast %cst_29 : f32 to vector<8x128xf32>
      %39 = arith.mulf %37, %38 : vector<8x128xf32>
      %c0_30 = arith.constant 0 : index
      %c0_31 = arith.constant 0 : index
      %40 = vector.load %arg7[%c0_30, %c0_31] : memref<8x128xf32, #tpu.memory_space<vmem>>, vector<8x128xf32>
      tpu.vector_store %arg7[%c0_30, %c0_31], %39 {strides = array<i32>} : memref<8x128xf32, #tpu.memory_space<vmem>>, vector<8x128xf32>,
      %cst_32 = arith.constant 0xFF800000 : f32
      %41 = vector.broadcast %cst_32 : f32 to vector<8x1xf32>
      %c0_33 = arith.constant 0 : index
      %c0_34 = arith.constant 0 : index
      %42 = vector.load %arg8[%c0_33, %c0_34] : memref<8x1xf32, #tpu.memory_space<vmem>>, vector<8x1xf32>
      tpu.vector_store %arg8[%c0_33, %c0_34], %41 {strides = array<i32>} : memref<8x1xf32, #tpu.memory_space<vmem>>, vector<8x1xf32>,
      %cst_35 = arith.constant 0.000000e+00 : f32
      %43 = vector.broadcast %cst_35 : f32 to vector<8x1xf32>
      %c0_36 = arith.constant 0 : index
      %c0_37 = arith.constant 0 : index
      %44 = vector.load %arg9[%c0_36, %c0_37] : memref<8x1xf32, #tpu.memory_space<vmem>>, vector<8x1xf32>
      tpu.vector_store %arg9[%c0_36, %c0_37], %43 {strides = array<i32>} : memref<8x1xf32, #tpu.memory_space<vmem>>, vector<8x1xf32>,
      %cst_38 = arith.constant 0.000000e+00 : f32
      %45 = vector.broadcast %cst_38 : f32 to vector<8x128xf32>
      %c0_39 = arith.constant 0 : index
      %c0_40 = arith.constant 0 : index
      %46 = vector.load %arg10[%c0_39, %c0_40] : memref<8x128xf32, #tpu.memory_space<vmem>>, vector<8x128xf32>
      tpu.vector_store %arg10[%c0_39, %c0_40], %45 {strides = array<i32>} : memref<8x128xf32, #tpu.memory_space<vmem>>, vector<8x128xf32>,
    } else {
    }
    %c0 = arith.constant 0 : index
    %c0_1 = arith.constant 0 : index
    %3 = vector.load %arg3[%c0, %c0_1] : memref<8x128xf32, #tpu.memory_space<vmem>>, vector<8x128xf32>
    %c0_2 = arith.constant 0 : index
    %c0_3 = arith.constant 0 : index
    %4 = vector.load %arg5[%c0_2, %c0_3] : memref<128x256xf32, #tpu.memory_space<vmem>>, vector<128x256xf32>
    %cst = arith.constant dense<0.000000e+00> : vector<8x256xf32>
    %5 = tpu.matmul %3, %4, %cst {dimension_numbers = #tpu.dot_dimension_numbers<[1], [0], [0], [1], [0, 0, 1, 1], [], []>, precision = #tpu.contract_precision<fp32>} : vector<8x128xf32>, vector<128x256xf32>, vector<8x256xf32> -> vector<8x256xf32>
    %6 = vector.extract_strided_slice %5 {offsets = [0, 0], sizes = [8, 128], strides = [1, 1]} : vector<8x256xf32> to vector<8x128xf32>
    %7 = vector.extract_strided_slice %5 {offsets = [0, 128], sizes = [8, 128], strides = [1, 1]} : vector<8x256xf32> to vector<8x128xf32>
    %c0_4 = arith.constant 0 : index
    %c0_5 = arith.constant 0 : index
    %8 = vector.load %arg7[%c0_4, %c0_5] : memref<8x128xf32, #tpu.memory_space<vmem>>, vector<8x128xf32>
    %cst_6 = arith.constant dense<0.000000e+00> : vector<8x8xf32>
    %9 = tpu.matmul %8, %6, %cst_6 {dimension_numbers = #tpu.dot_dimension_numbers<[1], [1], [0], [0], [0, 0, 1, 0], [], []>, precision = #tpu.contract_precision<fp32>} : vector<8x128xf32>, vector<8x128xf32>, vector<8x8xf32> -> vector<8x8xf32>
    %c0_7 = arith.constant 0 : index
    %c0_8 = arith.constant 0 : index
    %10 = vector.load %arg8[%c0_7, %c0_8] : memref<8x1xf32, #tpu.memory_space<vmem>>, vector<8x1xf32>
    %cst_9 = arith.constant dense<0xFF800000> : vector<8xf32>
    %11 = vector.multi_reduction <maximumf>, %9, %cst_9 [1] : vector<8x8xf32> to vector<8xf32>
    %12 = vector.shape_cast %11 : vector<8xf32> to vector<8x1xf32>
    %13 = arith.maximumf %10, %12 : vector<8x1xf32>
    %14 = arith.subf %10, %13 : vector<8x1xf32>
    %15 = math.exp %14 : vector<8x1xf32>
    %16 = vector.broadcast %13 : vector<8x1xf32> to vector<8x8xf32>
    %17 = arith.subf %9, %16 : vector<8x8xf32>
    %18 = math.exp %17 : vector<8x8xf32>
    %c0_10 = arith.constant 0 : index
    %c0_11 = arith.constant 0 : index
    %19 = vector.load %arg9[%c0_10, %c0_11] : memref<8x1xf32, #tpu.memory_space<vmem>>, vector<8x1xf32>
    %20 = arith.mulf %15, %19 : vector<8x1xf32>
    %cst_12 = arith.constant dense<0.000000e+00> : vector<8xf32>
    %21 = vector.multi_reduction <add>, %18, %cst_12 [1] : vector<8x8xf32> to vector<8xf32>
    %22 = vector.shape_cast %21 : vector<8xf32> to vector<8x1xf32>
    %23 = arith.addf %20, %22 : vector<8x1xf32>
    %c0_13 = arith.constant 0 : index
    %c0_14 = arith.constant 0 : index
    %24 = vector.load %arg9[%c0_13, %c0_14] : memref<8x1xf32, #tpu.memory_space<vmem>>, vector<8x1xf32>
    tpu.vector_store %arg9[%c0_13, %c0_14], %23 {strides = array<i32>} : memref<8x1xf32, #tpu.memory_space<vmem>>, vector<8x1xf32>,
    %c0_15 = arith.constant 0 : index
    %c0_16 = arith.constant 0 : index
    %25 = vector.load %arg10[%c0_15, %c0_16] : memref<8x128xf32, #tpu.memory_space<vmem>>, vector<8x128xf32>
    %26 = vector.broadcast %15 : vector<8x1xf32> to vector<8x128xf32>
    %27 = arith.mulf %26, %25 : vector<8x128xf32>
    %cst_17 = arith.constant dense<0.000000e+00> : vector<8x128xf32>
    %28 = tpu.matmul %18, %7, %cst_17 {dimension_numbers = #tpu.dot_dimension_numbers<[1], [0], [0], [1], [0, 0, 1, 1], [], []>, precision = #tpu.contract_precision<fp32>} : vector<8x8xf32>, vector<8x128xf32>, vector<8x128xf32> -> vector<8x128xf32>
    %29 = arith.addf %27, %28 : vector<8x128xf32>
    %c0_18 = arith.constant 0 : index
    %c0_19 = arith.constant 0 : index
    %30 = vector.load %arg10[%c0_18, %c0_19] : memref<8x128xf32, #tpu.memory_space<vmem>>, vector<8x128xf32>
    tpu.vector_store %arg10[%c0_18, %c0_19], %29 {strides = array<i32>} : memref<8x128xf32, #tpu.memory_space<vmem>>, vector<8x128xf32>,
    %c0_20 = arith.constant 0 : index
    %c0_21 = arith.constant 0 : index
    %31 = vector.load %arg8[%c0_20, %c0_21] : memref<8x1xf32, #tpu.memory_space<vmem>>, vector<8x1xf32>
    tpu.vector_store %arg8[%c0_20, %c0_21], %13 {strides = array<i32>} : memref<8x1xf32, #tpu.memory_space<vmem>>, vector<8x1xf32>,
    %c0_i32_22 = arith.constant 0 : i32
    %32 = arith.cmpi eq, %arg1, %c0_i32_22 : i32
    %33 = arith.extui %32 : i1 to i32
    %c0_i32_23 = arith.constant 0 : i32
    %34 = arith.cmpi ne, %33, %c0_i32_23 : i32
    scf.if %34 {
      %c0_24 = arith.constant 0 : index
      %c0_25 = arith.constant 0 : index
      %35 = vector.load %arg10[%c0_24, %c0_25] : memref<8x128xf32, #tpu.memory_space<vmem>>, vector<8x128xf32>
      %c0_26 = arith.constant 0 : index
      %c0_27 = arith.constant 0 : index
      %36 = vector.load %arg9[%c0_26, %c0_27] : memref<8x1xf32, #tpu.memory_space<vmem>>, vector<8x1xf32>
      %37 = vector.broadcast %36 : vector<8x1xf32> to vector<8x128xf32>
      %38 = arith.divf %35, %37 : vector<8x128xf32>
      %c0_28 = arith.constant 0 : index
      %c0_29 = arith.constant 0 : index
      %39 = vector.load %arg6[%c0_28, %c0_29] : memref<8x128xf32, #tpu.memory_space<vmem>>, vector<8x128xf32>
      tpu.vector_store %arg6[%c0_28, %c0_29], %38 {strides = array<i32>} : memref<8x128xf32, #tpu.memory_space<vmem>>, vector<8x128xf32>,
    } else {
    }
    return
  }
  func.func @transform_0(%arg0: i32, %arg1: i32) -> (i32, i32) {
    %c0_i32 = arith.constant 0 : i32
    %c0_i32_0 = arith.constant 0 : i32
    return %arg0, %c0_i32 : i32, i32
  }
  func.func @transform_1(%arg0: i32, %arg1: i32) -> (i32, i32) {
    %c0_i32 = arith.constant 0 : i32
    %c0_i32_0 = arith.constant 0 : i32
    return %arg1, %c0_i32 : i32, i32
  }
  func.func @transform_2(%arg0: i32, %arg1: i32) -> (i32, i32) {
    %c0_i32 = arith.constant 0 : i32
    %c0_i32_0 = arith.constant 0 : i32
    %c0_i32_1 = arith.constant 0 : i32
    return %c0_i32, %c0_i32_0 : i32, i32
  }
  func.func @transform_3(%arg0: i32, %arg1: i32) -> (i32, i32) {
    %c0_i32 = arith.constant 0 : i32
    %c0_i32_0 = arith.constant 0 : i32
    %c0_i32_1 = arith.constant 0 : i32
    return %c0_i32, %c0_i32_0 : i32, i32
  }
  func.func @transform_4(%arg0: i32, %arg1: i32) -> (i32, i32) {
    %c0_i32 = arith.constant 0 : i32
    %c0_i32_0 = arith.constant 0 : i32
    return %arg0, %c0_i32 : i32, i32
  }
}

</mosaic_0001>

<bundles_post_ra>
// kernel: tpu_custom_call.1
= control target key start
LH: loop header
LB: loop body
LE: loop exit
PB: predicated region body
PF: predicated region fallthrough
CT: control target
= control target key end

     0   :  { %9 = vsyncpa [#allocation7], 0  ;;  %s4139_s0 = inlined_call_operand.hbm [shape: f32[8,128], index: 0, kind: input, shape index: {}]   ;;  %s4140_s1 = inlined_call_operand.hbm [shape: f32[8,128], index: 1, kind: input, shape index: {}]   ;;  %s4141_s2 = inlined_call_operand.hbm [shape: f32[128,128], index: 2, kind: input, shape index: {}]   ;;  %s4142_s3 = inlined_call_operand.hbm [shape: f32[128,256], index: 3, kind: input, shape index: {}]   ;;  %s4143_s4 = inlined_call_operand.hbm [shape: f32[8,128], index: 4, kind: output, shape index: {}]  }
   0x1   :  { %10 = vsyncpa [#allocation10], 0 }
   0x2   :  { %11 = vsyncpa [#allocation13], 0 }
   0x3   :  { %12 = vsyncpa [#allocation8], 0  ;;  %s3111_s15 = smov [#allocation9]   ;;  %s3112_s17 = smov [#allocation6]  }
   0x4   :  { %s29_s16 = sshll.u32 %s3111_s15, 4  ;;  %s19_s18 = sshll.u32 %s3112_s17, 4  ;;  %s30_s16 = int_to_ptr.vmem [resolvable:$true] %s29_s16  ;;  %s20_s18 = int_to_ptr.vmem [resolvable:$true] %s19_s18 }
   0x5   :  { %s3011_s19 = scalar_lea.vmem %s30_s16, 128  ;;  %p3016_p1 = scmp.lt.s32.totalorder %s30_s16, %s30_s16 }
   0x6   :  { %p3012_p0 = scmp.ne.s32.totalorder %s30_s16, %s3011_s19  ;;  %p3017_p2 = scmp.lt.s32.totalorder %s3011_s19, %s3011_s19 }
   0x8   :  { %p3018_p3 = por %p3017_p2, %p3016_p1 }
   0xa   :  { %p3019_p4 = pnand %p3018_p3, %p3012_p0 }
   0xc   :  { %3022 = shalt.err (!%p3019_p4)
}
   0xd   :  { %32 = dma.hbm_to_vmem [thread:$0]  %s4140_s1, 128, %s30_s16, [#allocation10]  }
   0xe   :  { %s3031_s22 = scalar_lea.vmem %s20_s18, 128  ;;  %p3036_p6 = scmp.lt.s32.totalorder %s20_s18, %s20_s18 }
   0xf   :  { %p3032_p5 = scmp.ne.s32.totalorder %s20_s18, %s3031_s22  ;;  %p3037_p7 = scmp.lt.s32.totalorder %s3031_s22, %s3031_s22 }
  0x11   :  { %p3038_p8 = por %p3037_p7, %p3036_p6 }
  0x13   :  { %p3039_p9 = pnand %p3038_p8, %p3032_p5 }
  0x15   :  { %3042 = shalt.err (!%p3039_p9)
}
  0x16   :  { %22 = dma.hbm_to_vmem [thread:$0]  %s4139_s0, 128, %s20_s18, [#allocation7]  }
  0x17   :  { %s3113_s25 = smov [#allocation11]  }
  0x18   :  { %s38_s26 = sshll.u32 %s3113_s25, 4  ;;  %s39_s26 = int_to_ptr.vmem [resolvable:$true] %s38_s26 }
  0x19   :  { %s3051_s27 = scalar_lea.vmem %s39_s26, 2048  ;;  %p3056_p11 = scmp.lt.s32.totalorder %s39_s26, %s39_s26 }
  0x1a   :  { %p3052_p10 = scmp.ne.s32.totalorder %s39_s26, %s3051_s27  ;;  %p3057_p12 = scmp.lt.s32.totalorder %s3051_s27, %s3051_s27 }
  0x1c   :  { %p3058_p13 = por %p3057_p12, %p3056_p11 }
  0x1e   :  { %p3059_p0 = pnand %p3058_p13, %p3052_p10 }
  0x20   :  { %3062 = shalt.err (!%p3059_p0)
}
  0x21   :  { %s3114_s1 = smov 128   ;;  %s3115_s28 = smov 8  }
  0x22   :  { %44 = dma.hbm_to_vmem [thread:$0]  %s4141_s2, 2048, %s39_s26, [#allocation10], %s3114_s1, %s3114_s1, %s3115_s28  }
  0x23   :  { %s3116_s5 = smov [#allocation12]  }
  0x24   :  { %s50_s6 = sshll.u32 %s3116_s5, 4  ;;  %s51_s6 = int_to_ptr.vmem [resolvable:$true] %s50_s6 }
  0x25   :  { %s3071_s0 = scalar_lea.vmem %s51_s6, 4096  ;;  %p3076_p2 = scmp.lt.s32.totalorder %s51_s6, %s51_s6 }
  0x26   :  { %p3072_p1 = scmp.ne.s32.totalorder %s51_s6, %s3071_s0  ;;  %p3077_p3 = scmp.lt.s32.totalorder %s3071_s0, %s3071_s0 }
  0x28   :  { %p3078_p4 = por %p3077_p3, %p3076_p2 }
  0x2a   :  { %p3079_p5 = pnand %p3078_p4, %p3072_p1 }
  0x2c   :  { %3082 = shalt.err (!%p3079_p5)
}
  0x2d   :  { %s3117_s7 = smov 256   ;;  %s3118_s8 = smov 16  }
  0x2e   :  { %56 = dma.hbm_to_vmem [thread:$0]  %s4142_s3, 4096, %s51_s6, [#allocation13], %s3117_s7, %s3117_s7, %s3118_s8  }
  0x2f   :  { %3103 = dma.done.wait [#allocation7], 128  }
  0x30   :  { %3104 = vsyncadd [#allocation7], 4294967168 }
  0x31   :  { %3105 = dma.done.wait [#allocation10], 2176  }
  0x32   :  { %3106 = vsyncadd [#allocation10], 4294965120 }
  0x33   :  { %3107 = dma.done.wait [#allocation13], 4096  }
  0x34   :  { %3108 = vsyncadd [#allocation13], 4294963200  ;;  %v4154_v0 = vmov 0.0   ;;  %vm3120_vm0 = vmmov 0   ;;  %v89_v1 = vld [vmem:[#allocation11 + $0x78] sm:$0xff]  ;;  %v88_v2 = vld [vmem:[#allocation11 + $0x70] sm:$0xff] }
  0x35   :  { %2712 = vmatprep.subr.mxu0 %v4154_v0  ;;  %2747 = vmatprep.subr.mxu1 %v4154_v0  ;;  %v87_v3 = vld [vmem:[#allocation11 + $0x68] sm:$0xff]  ;;  %v3167_v4 = vand.u32 4294901760, %v89_v1  ;;  %v3169_v5 = vand.u32 4294901760, %v88_v2  ;;  %v86_v7 = vld [vmem:[#allocation11 + $0x60] sm:$0xff]  ;;  %v85_v8 = vld [vmem:[#allocation11 + $0x58] sm:$0xff]  ;;  %vm733_vm1 = vcmask 7168  }
  0x36   :  { %2744 = vmatprep.mubr.msk.f32.mxu0 %vm3120_vm0, %v4154_v0  ;;  %2779 = vmatprep.mubr.msk.f32.mxu1 %vm3120_vm0, %v4154_v0  ;;  %v3171_v6 = vand.u32 4294901760, %v87_v3  ;;  %v84_v9 = vld [vmem:[#allocation11 + $0x50] sm:$0xff]  ;;  %v3173_v10 = vand.u32 4294901760, %v86_v7  ;;  %v3175_v11 = vand.u32 4294901760, %v85_v8  ;;  %v83_v13 = vld [vmem:[#allocation11 + $0x48] sm:$0xff]  ;;  %v82_v14 = vld [vmem:[#allocation11 + $0x40] sm:$0xff] }
  0x37   :  { %v3177_v12 = vand.u32 4294901760, %v84_v9  ;;  %2713 = vmatpush3.msra.mxu0 %v3167_v4  ;;  %v3181_v15 = vsub.f32 %v89_v1, %v3167_v4  ;;  %v3184_v16 = vsub.f32 %v88_v2, %v3169_v5  ;;  %v3186_v17 = vand.u32 4294901760, %v83_v13  ;;  %v81_v19 = vld [vmem:[#allocation11 + $0x38] sm:$0xff]  ;;  %v80_v26 = vld [vmem:[#allocation11 + $0x30] sm:$0xff]  ;;  %v79_v36 = vld [vmem:[#allocation11 + $0x28] sm:$0xff]  ;;  %s3123_s2 = smov [#allocation14]  }
  0x38   :  { %v3189_v18 = vsub.f32 %v87_v3, %v3171_v6  ;;  %2714 = vmatprep.subr.mxu0 %v4154_v0  ;;  %v3193_v20 = vsub.f32 %v86_v7, %v3173_v10  ;;  %v3196_v21 = vsub.f32 %v85_v8, %v3175_v11  ;;  %v3202_v25 = vand.u32 4294901760, %v82_v14  ;;  %v78_v41 = vld [vmem:[#allocation11 + $0x20] sm:$0xff]  ;;  %v77_v49 = vld [vmem:[#allocation11 + $0x18] sm:$0xff]  ;;  %v73_v50 = vld [vmem:[#allocation6] sm:$0xff]  ;;  %s2575_s3 = sshll.u32 %s3123_s2, 4  ;;  %s2576_s3 = int_to_ptr.vmem [resolvable:$true] %s2575_s3 }
  0x39   :  { %2715 = vmatpush3.msra.mxu0 %v3169_v5  ;;  %v184_v22 = vand.u32 4294901760, %v3181_v15  ;;  %v191_v23 = vand.u32 4294901760, %v3184_v16  ;;  %v3206_v28 = vand.u32 4294901760, %v81_v19  ;;  %v3210_v30 = vsub.f32 %v84_v9, %v3177_v12  ;;  %v76_v54 = vld [vmem:[#allocation11 + $0x10] sm:$0xff]  ;;  %v75_v60 = vld [vmem:[#allocation11 + $0x8] sm:$0xff]  ;;  %v74_v7 = vld [vmem:[#allocation11] sm:$0xff]  ;;  %p3088_p7 = scmp.lt.s32.totalorder %s2576_s3, %s2576_s3 }
  0x3a   :  { %v198_v24 = vand.u32 4294901760, %v3189_v18  ;;  %2716 = vmatprep.subr.mxu0 %v4154_v0  ;;  %v205_v27 = vand.u32 4294901760, %v3193_v20  ;;  %v212_v29 = vand.u32 4294901760, %v3196_v21  ;;  %v3223_v34 = vsub.f32 %v83_v13, %v3186_v17  ;;  %s3083_s11 = scalar_lea.vmem %s2576_s3, 128 }
  0x3b   :  { %2717 = vmatpush3.msra.mxu0 %v3171_v6  ;;  %v185_v31 = vsub.f32 %v3181_v15, %v184_v22  ;;  %v192_v32 = vsub.f32 %v3184_v16, %v191_v23  ;;  %v3226_v35 = vand.u32 4294901760, %v80_v26  ;;  %v219_v40 = vand.u32 4294901760, %v3210_v30  ;;  %p3084_p6 = scmp.ne.s32.totalorder %s2576_s3, %s3083_s11  ;;  %p3089_p8 = scmp.lt.s32.totalorder %s3083_s11, %s3083_s11 }
  0x3c   :  { %v199_v33 = vsub.f32 %v3189_v18, %v198_v24  ;;  %2718 = vmatprep.subr.mxu0 %v4154_v0  ;;  %v206_v39 = vsub.f32 %v3193_v20, %v205_v27  ;;  %v213_v42 = vsub.f32 %v3196_v21, %v212_v29  ;;  %v3238_v43 = vsub.f32 %v82_v14, %v3202_v25 }
  0x3d   :  { %2719 = vmatpush3.msra.mxu0 %v3173_v10  ;;  %v186_v37 = vand.u32 4294901760, %v185_v31  ;;  %v193_v38 = vand.u32 4294901760, %v192_v32  ;;  %v3241_v45 = vand.u32 4294901760, %v79_v36  ;;  %v226_v46 = vand.u32 4294901760, %v3223_v34  ;;  %p3090_p9 = por %p3089_p8, %p3088_p7 }
  0x3e   :  { %2720 = vmatprep.subr.mxu0 %v4154_v0  ;;  %v200_v44 = vand.u32 4294901760, %v199_v33  ;;  %v3245_v47 = vsub.f32 %v81_v19, %v3206_v28  ;;  %v3249_v48 = vand.u32 4294901760, %v78_v41  ;;  %v207_v51 = vand.u32 4294901760, %v206_v39 }
  0x3f   :  { %2721 = vmatpush3.msra.mxu0 %v3175_v11  ;;  %2748 = vmatpush3.msra.mxu1 %v186_v37  ;;  %v220_v52 = vsub.f32 %v3210_v30, %v219_v40  ;;  %v233_v53 = vand.u32 4294901760, %v3238_v43  ;;  %v3257_v55 = vsub.f32 %v80_v26, %v3226_v35  ;;  %v214_v56 = vand.u32 4294901760, %v213_v42  ;;  %p3091_p10 = pnand %p3090_p9, %p3084_p6 }
  0x40   :  { %2722 = vmatprep.subr.mxu0 %v4154_v0  ;;  %2749 = vmatprep.subr.mxu1 %v4154_v0  ;;  %v240_v57 = vand.u32 4294901760, %v3245_v47  ;;  %v227_v58 = vsub.f32 %v3223_v34, %v226_v46  ;;  %v3266_v59 = vand.u32 4294901760, %v77_v49  ;;  %v3269_v61 = vsub.f32 %v79_v36, %v3241_v45 }
  0x41   :  { %2723 = vmatpush3.msra.mxu0 %v3177_v12  ;;  %2750 = vmatpush3.msra.mxu1 %v193_v38  ;;  %v3271_v62 = vand.u32 4294901760, %v73_v50  ;;  %v3275_v63 = vand.u32 4294901760, %v76_v54  ;;  %v221_v1 = vand.u32 4294901760, %v220_v52  ;;  %v234_v2 = vsub.f32 %v3238_v43, %v233_v53 }
  0x42   :  { %2724 = vmatprep.subr.mxu0 %v4154_v0  ;;  %2751 = vmatprep.subr.mxu1 %v4154_v0  ;;  %v247_v3 = vand.u32 4294901760, %v3257_v55  ;;  %v3283_v8 = vsub.f32 %v78_v41, %v3249_v48  ;;  %v241_v9 = vsub.f32 %v3245_v47, %v240_v57  ;;  %v3290_v13 = vand.u32 4294901760, %v75_v60 }
  0x43   :  { %2725 = vmatpush3.msra.mxu0 %v3186_v17  ;;  %2752 = vmatpush3.msra.mxu1 %v200_v44  ;;  %v228_v14 = vand.u32 4294901760, %v227_v58  ;;  %v254_v19 = vand.u32 4294901760, %v3269_v61  ;;  %v3295_v26 = vsub.f32 %v73_v50, %v3271_v62  ;;  %v3298_v31 = vsub.f32 %v77_v49, %v3266_v59 }
  0x44   :  { %2726 = vmatprep.subr.mxu0 %v4154_v0  ;;  %2753 = vmatprep.subr.mxu1 %v4154_v0  ;;  %v3302_v32 = vand.u32 4294901760, %v74_v7  ;;  %v235_v33 = vand.u32 4294901760, %v234_v2  ;;  %v248_v36 = vsub.f32 %v3257_v55, %v247_v3  ;;  %v261_v37 = vand.u32 4294901760, %v3283_v8 }
  0x45   :  { %2727 = vmatpush3.msra.mxu0 %v3202_v25  ;;  %2754 = vmatpush3.msra.mxu1 %v207_v51  ;;  %v3310_v38 = vsub.f32 %v76_v54, %v3275_v63  ;;  %v242_v39 = vand.u32 4294901760, %v241_v9  ;;  %v255_v41 = vsub.f32 %v3269_v61, %v254_v19  ;;  %v173_v42 = vand.u32 4294901760, %v3295_v26 }
  0x46   :  { %2728 = vmatprep.subr.mxu0 %v4154_v0  ;;  %2755 = vmatprep.subr.mxu1 %v4154_v0  ;;  %v268_v44 = vand.u32 4294901760, %v3298_v31  ;;  %v3321_v49 = vsub.f32 %v75_v60, %v3290_v13  ;;  %v249_v50 = vand.u32 4294901760, %v248_v36  ;;  %v262_v51 = vsub.f32 %v3283_v8, %v261_v37 }
  0x47   :  { %2729 = vmatpush3.msra.mxu0 %v3206_v28  ;;  %2756 = vmatpush3.msra.mxu1 %v214_v56  ;;  %v275_v52 = vand.u32 4294901760, %v3310_v38  ;;  %v3331_v54 = vsub.f32 %v74_v7, %v3302_v32  ;;  %v256_v56 = vand.u32 4294901760, %v255_v41  ;;  %v174_v58 = vsub.f32 %v3295_v26, %v173_v42 }
  0x48   :  { %2730 = vmatprep.subr.mxu0 %v4154_v0  ;;  %2757 = vmatprep.subr.mxu1 %v4154_v0  ;;  %v269_v60 = vsub.f32 %v3298_v31, %v268_v44  ;;  %v263_v2 = vand.u32 4294901760, %v262_v51  ;;  %vm2073_vm2 = vcmask 64512  }
  0x49   :  { %2731 = vmatpush3.msra.mxu0 %v3226_v35  ;;  %2758 = vmatpush3.msra.mxu1 %v221_v1  ;;  %v282_v1 = vand.u32 4294901760, %v3321_v49  ;;  %v276_v7 = vsub.f32 %v3310_v38, %v275_v52  ;;  %v289_v9 = vand.u32 4294901760, %v3331_v54 }
  0x4a   :  { %2732 = vmatprep.subr.mxu0 %v4154_v0  ;;  %2759 = vmatprep.subr.mxu1 %v4154_v0 }
  0x4b   :  { %2733 = vmatpush3.msra.mxu0 %v3241_v45  ;;  %2760 = vmatpush3.msra.mxu1 %v228_v14  ;;  %v175_v14 = vand.u32 4294901760, %v174_v58  ;;  %v283_v36 = vsub.f32 %v3321_v49, %v282_v1  ;;  %v290_v41 = vsub.f32 %v3331_v54, %v289_v9 }
  0x4c   :  { %2734 = vmatprep.subr.mxu0 %v4154_v0  ;;  %2761 = vmatprep.subr.mxu1 %v4154_v0 }
  0x4d   :  { %2735 = vmatpush3.msra.mxu0 %v3249_v48  ;;  %2762 = vmatpush3.msra.mxu1 %v235_v33  ;;  %v270_v33 = vand.u32 4294901760, %v269_v60  ;;  %v291_v51 = vand.u32 4294901760, %v290_v41  ;;  %v746_v41 = vld [vmem:[#allocation12 + $0x40] sm:$0xff] }
  0x4e   :  { %2736 = vmatprep.subr.mxu0 %v4154_v0  ;;  %2763 = vmatprep.subr.mxu1 %v4154_v0 }
  0x4f   :  { %2737 = vmatpush3.msra.mxu0 %v3266_v59  ;;  %2764 = vmatpush3.msra.mxu1 %v242_v39  ;;  %v277_v39 = vand.u32 4294901760, %v276_v7  ;;  %v754_v7 = vld [vmem:[#allocation12 + $0x80] sm:$0xff] }
  0x50   :  { %2738 = vmatprep.subr.mxu0 %v4154_v0  ;;  %2765 = vmatprep.subr.mxu1 %v4154_v0 }
  0x51   :  { %2739 = vmatpush3.msra.mxu0 %v3275_v63  ;;  %2766 = vmatpush3.msra.mxu1 %v249_v50  ;;  %v284_v50 = vand.u32 4294901760, %v283_v36 }
  0x52   :  { %2740 = vmatprep.subr.mxu0 %v4154_v0  ;;  %2767 = vmatprep.subr.mxu1 %v4154_v0 }
  0x53   :  { %2741 = vmatpush3.msra.mxu0 %v3290_v13  ;;  %2768 = vmatpush3.msra.mxu1 %v256_v56  ;;  %v755_v56 = vld [vmem:[#allocation12 + $0x88] sm:$0xff] }
  0x54   :  { %2742 = vmatprep.subr.mxu0 %v4154_v0  ;;  %2769 = vmatprep.subr.mxu1 %v4154_v0 }
  0x55   :  { %2743 = vmatpush3.msra.mxu0 %v3302_v32  ;;  %2770 = vmatpush3.msra.mxu1 %v263_v2 }
  0x56   :  { %2771 = vmatprep.subr.mxu1 %v4154_v0  ;;  %2782 = vmatprep.subr.mxu0 %v4154_v0 }
  0x57   :  { %2745 = vmatmul.mubr.f32.vlgmr.msra.gmra.mxu0 %v175_v14  ;;  %2772 = vmatpush3.msra.mxu1 %v270_v33 }
  0x58   :  { %2783 = vmatpush3.msra.mxu0 %v3181_v15  ;;  %2773 = vmatprep.subr.mxu1 %v4154_v0  ;;  %v768_v15 = vld [vmem:[#allocation12 + $0xf0] sm:$0xff] }
  0x59   :  { %2784 = vmatprep.subr.mxu0 %v4154_v0  ;;  %2774 = vmatpush3.msra.mxu1 %v277_v39  ;;  %v744_v39 = vld [vmem:[#allocation12 + $0x30] sm:$0xff] }
  0x5a   :  { %2785 = vmatpush3.msra.mxu0 %v3184_v16  ;;  %2775 = vmatprep.subr.mxu1 %v4154_v0  ;;  %v766_v16 = vld [vmem:[#allocation12 + $0xe0] sm:$0xff] }
  0x5b   :  { %2786 = vmatprep.subr.mxu0 %v4154_v0  ;;  %2776 = vmatpush3.msra.mxu1 %v284_v50  ;;  %v3609_v50 = vand.u32 4294901760, %v755_v56 }
  0x5c   :  { %2787 = vmatpush3.msra.mxu0 %v3189_v18  ;;  %2777 = vmatprep.subr.mxu1 %v4154_v0  ;;  %v767_v18 = vld [vmem:[#allocation12 + $0xe8] sm:$0xff] }
  0x5d   :  { %2788 = vmatprep.subr.mxu0 %v4154_v0  ;;  %2778 = vmatpush3.msra.mxu1 %v291_v51  ;;  %4211 = vst [vmem:[#allocation28_spill] sm:$0xff] %v3609_v50  ;;  %v752_v51 = vld [vmem:[#allocation12 + $0x70] sm:$0xff] }
  0x5e   :  { %2789 = vmatpush3.msra.mxu0 %v3193_v20  ;;  %2780 = vmatmul.mubr.f32.vlgmr.msra.gmra.mxu1 %v3271_v62  ;;  %v3479_v20 = vand.u32 4294901760, %v766_v16 }
  0x5f   :  { %2790 = vmatprep.subr.mxu0 %v4154_v0  ;;  %2817 = vmatprep.subr.mxu1 %v4154_v0 }
  0x60   :  { %2791 = vmatpush3.msra.mxu0 %v3196_v21  ;;  %2818 = vmatpush3.msra.mxu1 %v3167_v4  ;;  %v764_v21 = vld [vmem:[#allocation12 + $0xd0] sm:$0xff] }
  0x61   :  { %2792 = vmatprep.subr.mxu0 %v4154_v0  ;;  %2819 = vmatprep.subr.mxu1 %v4154_v0 }
  0x62   :  { %2793 = vmatpush3.msra.mxu0 %v3210_v30  ;;  %2820 = vmatpush3.msra.mxu1 %v3169_v5 }
  0x63   :  { %2794 = vmatprep.subr.mxu0 %v4154_v0  ;;  %2821 = vmatprep.subr.mxu1 %v4154_v0 }
  0x64   :  { %2795 = vmatpush3.msra.mxu0 %v3223_v34  ;;  %2822 = vmatpush3.msra.mxu1 %v3171_v6  ;;  %v761_v34 = vld [vmem:[#allocation12 + $0xb8] sm:$0xff] }
  0x65   :  { %2796 = vmatprep.subr.mxu0 %v4154_v0  ;;  %2823 = vmatprep.subr.mxu1 %v4154_v0 }
  0x66   :  { %2797 = vmatpush3.msra.mxu0 %v3238_v43  ;;  %2824 = vmatpush3.msra.mxu1 %v3173_v10 }
  0x67   :  { %2798 = vmatprep.subr.mxu0 %v4154_v0  ;;  %2825 = vmatprep.subr.mxu1 %v4154_v0 }
  0x68   :  { %2799 = vmatpush3.msra.mxu0 %v3245_v47  ;;  %2826 = vmatpush3.msra.mxu1 %v3175_v11  ;;  %v759_v47 = vld [vmem:[#allocation12 + $0xa8] sm:$0xff] }
  0x69   :  { %2800 = vmatprep.subr.mxu0 %v4154_v0  ;;  %2827 = vmatprep.subr.mxu1 %v4154_v0 }
  0x6a   :  { %2801 = vmatpush3.msra.mxu0 %v3257_v55  ;;  %2828 = vmatpush3.msra.mxu1 %v3177_v12 }
  0x6b   :  { %2802 = vmatprep.subr.mxu0 %v4154_v0  ;;  %2829 = vmatprep.subr.mxu1 %v4154_v0 }
  0x6c   :  { %2803 = vmatpush3.msra.mxu0 %v3269_v61  ;;  %2830 = vmatpush3.msra.mxu1 %v3186_v17 }
  0x6d   :  { %2804 = vmatprep.subr.mxu0 %v4154_v0  ;;  %2831 = vmatprep.subr.mxu1 %v4154_v0 }
  0x6e   :  { %2805 = vmatpush3.msra.mxu0 %v3283_v8  ;;  %2832 = vmatpush3.msra.mxu1 %v3202_v25 }
  0x6f   :  { %2806 = vmatprep.subr.mxu0 %v4154_v0  ;;  %2833 = vmatprep.subr.mxu1 %v4154_v0 }
  0x70   :  { %2807 = vmatpush3.msra.mxu0 %v3298_v31  ;;  %2834 = vmatpush3.msra.mxu1 %v3206_v28 }
  0x71   :  { %2808 = vmatprep.subr.mxu0 %v4154_v0  ;;  %2835 = vmatprep.subr.mxu1 %v4154_v0 }
  0x72   :  { %2809 = vmatpush3.msra.mxu0 %v3310_v38  ;;  %2836 = vmatpush3.msra.mxu1 %v3226_v35  ;;  %v757_v38 = vld [vmem:[#allocation12 + $0x98] sm:$0xff] }
  0x73   :  { %2810 = vmatprep.subr.mxu0 %v4154_v0  ;;  %2837 = vmatprep.subr.mxu1 %v4154_v0 }
  0x74   :  { %2811 = vmatpush3.msra.mxu0 %v3321_v49  ;;  %2838 = vmatpush3.msra.mxu1 %v3241_v45 }
  0x75   :  { %2812 = vmatprep.subr.mxu0 %v4154_v0  ;;  %2839 = vmatprep.subr.mxu1 %v4154_v0 }
  0x76   :  { %2813 = vmatpush3.msra.mxu0 %v3331_v54  ;;  %2814 = vmatprep.mubr.msk.f32.mxu0 %vm3120_vm0, %v4154_v0 }
  0x77   :  { %2840 = vmatpush3.msra.mxu1 %v3249_v48  ;;  %2815 = vmatmul.mubr.f32.vlgmr.msra.gmra.mxu0 %v3295_v26  ;;  %v3546_v26 = vand.u32 4294901760, %v759_v47 }
  0x78   :  { %2841 = vmatprep.subr.mxu1 %v4154_v0  ;;  %2852 = vmatprep.subr.mxu0 %v4154_v0 }
  0x79   :  { %2842 = vmatpush3.msra.mxu1 %v3266_v59  ;;  %2853 = vmatpush3.msra.mxu0 %v184_v22  ;;  %4207 = vst [vmem:[#allocation24_spill] sm:$0xff] %v3546_v26  ;;  %v3602_v36 = vsub.f32 %v759_v47, %v3546_v26 }
  0x7a   :  { %2843 = vmatprep.subr.mxu1 %v4154_v0  ;;  %2854 = vmatprep.subr.mxu0 %v4154_v0 }
  0x7b   :  { %2844 = vmatpush3.msra.mxu1 %v3275_v63  ;;  %2855 = vmatpush3.msra.mxu0 %v191_v23  ;;  %v3497_v23 = vsub.f32 %v766_v16, %v3479_v20 }
  0x7c   :  { %2845 = vmatprep.subr.mxu1 %v4154_v0  ;;  %2856 = vmatprep.subr.mxu0 %v4154_v0 }
  0x7d   :  { %2846 = vmatpush3.msra.mxu1 %v3290_v13  ;;  %2857 = vmatpush3.msra.mxu0 %v198_v24  ;;  %v4147_v55 = vand.u32 4294901760, %v3497_v23 }
  0x7e   :  { %2847 = vmatprep.subr.mxu1 %v4154_v0  ;;  %2858 = vmatprep.subr.mxu0 %v4154_v0 }
  0x7f   :  { %2848 = vmatpush3.msra.mxu1 %v3302_v32  ;;  %2849 = vmatprep.mubr.msk.f32.mxu1 %vm3120_vm0, %v4154_v0 }
  0x80   :  { %2859 = vmatpush3.msra.mxu0 %v205_v27  ;;  %2850 = vmatmul.mubr.f32.vlgmr.msra.gmra.mxu1 %v173_v42  ;;  %v756_v42 = vld [vmem:[#allocation12 + $0x90] sm:$0xff] }
  0x81   :  { %2860 = vmatprep.subr.mxu0 %v4154_v0  ;;  %2887 = vmatprep.subr.mxu1 %v4154_v0  ;;  %v3585_v2 = vand.u32 4294901760, %v756_v42 }
  0x82   :  { %2861 = vmatpush3.msra.mxu0 %v212_v29  ;;  %2888 = vmatpush3.msra.mxu1 %v3167_v4  ;;  %v769_v4 = vld [vmem:[#allocation12 + $0xf8] sm:$0xff]  ;;  %v3506_v29 = vand.u32 4294901760, %v764_v21 }
  0x83   :  { %2862 = vmatprep.subr.mxu0 %v4154_v0  ;;  %2889 = vmatprep.subr.mxu1 %v4154_v0  ;;  %4210 = vst [vmem:[#allocation27_spill] sm:$0xff] %v3585_v2 }
  0x84   :  { %2863 = vmatpush3.msra.mxu0 %v219_v40  ;;  %2890 = vmatpush3.msra.mxu1 %v3169_v5  ;;  %v3475_v5 = vand.u32 4294901760, %v769_v4  ;;  %4202 = vst [vmem:[#allocation19_spill] sm:$0xff] %v3506_v29  ;;  %v760_v40 = vld [vmem:[#allocation12 + $0xb0] sm:$0xff] }
  0x85   :  { %2864 = vmatprep.subr.mxu0 %v4154_v0  ;;  %2891 = vmatprep.subr.mxu1 %v4154_v0  ;;  %v3539_v8 = vand.u32 4294901760, %v760_v40 }
  0x86   :  { %2865 = vmatpush3.msra.mxu0 %v226_v46  ;;  %2892 = vmatpush3.msra.mxu1 %v3171_v6  ;;  %v3477_v6 = vand.u32 4294901760, %v768_v15  ;;  %v3500_v24 = vsub.f32 %v769_v4, %v3475_v5 }
  0x87   :  { %2866 = vmatprep.subr.mxu0 %v4154_v0  ;;  %2893 = vmatprep.subr.mxu1 %v4154_v0  ;;  %4206 = vst [vmem:[#allocation23_spill] sm:$0xff] %v3539_v8  ;;  %v3581_v60 = vsub.f32 %v760_v40, %v3539_v8 }
  0x88   :  { %2867 = vmatpush3.msra.mxu0 %v233_v53  ;;  %2894 = vmatpush3.msra.mxu1 %v3173_v10  ;;  %v765_v10 = vld [vmem:[#allocation12 + $0xd8] sm:$0xff]  ;;  %v3494_v22 = vsub.f32 %v768_v15, %v3477_v6  ;;  %v4153_v46 = vand.u32 4294901760, %v3500_v24  ;;  %v758_v53 = vld [vmem:[#allocation12 + $0xa0] sm:$0xff] }
  0x89   :  { %2868 = vmatprep.subr.mxu0 %v4154_v0  ;;  %2895 = vmatprep.subr.mxu1 %v4154_v0  ;;  %v3504_v27 = vand.u32 4294901760, %v765_v10 }
  0x8a   :  { %2869 = vmatpush3.msra.mxu0 %v240_v57  ;;  %2896 = vmatpush3.msra.mxu1 %v3175_v11  ;;  %v3488_v11 = vand.u32 4294901760, %v767_v18  ;;  %v3527_v57 = vsub.f32 %v764_v21, %v3506_v29  ;;  %v750_v21 = vld [vmem:[#allocation12 + $0x60] sm:$0xff] }
  0x8b   :  { %2870 = vmatprep.subr.mxu0 %v4154_v0  ;;  %2897 = vmatprep.subr.mxu1 %v4154_v0 }
  0x8c   :  { %2871 = vmatpush3.msra.mxu0 %v247_v3  ;;  %2898 = vmatpush3.msra.mxu1 %v3177_v12  ;;  %v762_v12 = vld [vmem:[#allocation12 + $0xc0] sm:$0xff]  ;;  %v3516_v43 = vsub.f32 %v767_v18, %v3488_v11  ;;  %v3532_v3 = vsub.f32 %v765_v10, %v3504_v27  ;;  %v4144_v49 = vand.u32 4294901760, %v3527_v57  ;;  %v3624_v18 = vand.u32 4294901760, %v754_v7  ;;  %v753_v10 = vld [vmem:[#allocation12 + $0x78] sm:$0xff] }
  0x8d   :  { %2872 = vmatprep.subr.mxu0 %v4154_v0  ;;  %2899 = vmatprep.subr.mxu1 %v4154_v0  ;;  %v3513_v30 = vand.u32 4294901760, %v762_v12 }
  0x8e   :  { %2873 = vmatpush3.msra.mxu0 %v254_v19  ;;  %2900 = vmatpush3.msra.mxu1 %v3186_v17  ;;  %v763_v17 = vld [vmem:[#allocation12 + $0xc8] sm:$0xff]  ;;  %v4148_v31 = vand.u32 4294901760, %v3516_v43  ;;  %v3621_v15 = vsub.f32 %v3527_v57, %v4144_v49  ;;  %4212 = vst [vmem:[#allocation29_spill] sm:$0xff] %v3624_v18  ;;  %v3655_v49 = vsub.f32 %v755_v56, %v3609_v50 }
  0x8f   :  { %2874 = vmatprep.subr.mxu0 %v4154_v0  ;;  %2901 = vmatprep.subr.mxu1 %v4154_v0  ;;  %4203 = vst [vmem:[#allocation20_spill] sm:$0xff] %v3513_v30  ;;  %v3529_v61 = vand.u32 4294901760, %v763_v17  ;;  %v3544_v19 = vsub.f32 %v762_v12, %v3513_v30 }
  0x90   :  { %2875 = vmatpush3.msra.mxu0 %v261_v37  ;;  %2902 = vmatpush3.msra.mxu1 %v3202_v25  ;;  %v4149_v25 = vand.u32 4294901760, %v3494_v22  ;;  %v3549_v37 = vand.u32 4294901760, %v758_v53  ;;  %v3595_v54 = vsub.f32 %v3516_v43, %v4148_v31  ;;  %v3667_v31 = vsub.f32 %v754_v7, %v3624_v18 }
  0x91   :  { %2876 = vmatprep.subr.mxu0 %v4154_v0  ;;  %2903 = vmatprep.subr.mxu1 %v4154_v0  ;;  %4204 = vst [vmem:[#allocation21_spill] sm:$0xff] %v3529_v61  ;;  %v3574_v58 = vsub.f32 %v763_v17, %v3529_v61  ;;  %v4145_v33 = vand.u32 4294901760, %v3544_v19  ;;  %v4152_v17 = vand.u32 4294901760, %v3581_v60 }
  0x92   :  { %2877 = vmatpush3.msra.mxu0 %v268_v44  ;;  %2904 = vmatpush3.msra.mxu1 %v3206_v28  ;;  %v3537_v28 = vand.u32 4294901760, %v761_v34  ;;  %4208 = vst [vmem:[#allocation25_spill] sm:$0xff] %v3549_v37  ;;  %v3562_v44 = vsub.f32 %v3494_v22, %v4149_v25  ;;  %v894_v40 = vand.u32 4294901760, %v3595_v54  ;;  %4216 = vst [vmem:[#allocation33_spill] sm:$0xff] %v3667_v31  ;;  %v748_v25 = vld [vmem:[#allocation12 + $0x50] sm:$0xff] }
  0x93   :  { %2878 = vmatprep.subr.mxu0 %v4154_v0  ;;  %2905 = vmatprep.subr.mxu1 %v4154_v0  ;;  %v4150_v16 = vand.u32 4294901760, %v3574_v58  ;;  %v3642_v47 = vsub.f32 %v3544_v19, %v4145_v33  ;;  %v3679_v56 = vsub.f32 %v3581_v60, %v4152_v17 }
  0x94   :  { %2879 = vmatpush3.msra.mxu0 %v275_v52  ;;  %2906 = vmatpush3.msra.mxu1 %v3226_v35  ;;  %4205 = vst [vmem:[#allocation22_spill] sm:$0xff] %v3537_v28  ;;  %v3557_v35 = vsub.f32 %v3500_v24, %v4153_v46  ;;  %v3567_v52 = vsub.f32 %v3497_v23, %v4147_v55 }
  0x95   :  { %2880 = vmatprep.subr.mxu0 %v4154_v0  ;;  %2907 = vmatprep.subr.mxu1 %v4154_v0  ;;  %v3588_v14 = vsub.f32 %v761_v34, %v3537_v28  ;;  %v3664_v55 = vsub.f32 %v3574_v58, %v4150_v16  ;;  %v924_v16 = vand.u32 4294901760, %v3642_v47  ;;  %v3707_v47 = vand.u32 4294901760, %v748_v25 }
  0x96   :  { %2881 = vmatpush3.msra.mxu0 %v282_v1  ;;  %2908 = vmatpush3.msra.mxu1 %v3241_v45  ;;  %v4146_v45 = vand.u32 4294901760, %v3532_v3  ;;  %v3583_v1 = vand.u32 4294901760, %v757_v38 }
  0x97   :  { %2882 = vmatprep.subr.mxu0 %v4154_v0  ;;  %2909 = vmatprep.subr.mxu1 %v4154_v0  ;;  %v4151_v12 = vand.u32 4294901760, %v3588_v14  ;;  %4218 = vst [vmem:[#allocation35_spill] sm:$0xff] %v3707_v47  ;;  %v918_v46 = vand.u32 4294901760, %v3664_v55 }
  0x98   :  { %2883 = vmatpush3.msra.mxu0 %v289_v9  ;;  %2884 = vmatprep.mubr.msk.f32.mxu0 %vm3120_vm0, %v4154_v0  ;;  %4209 = vst [vmem:[#allocation26_spill] sm:$0xff] %v3583_v1  ;;  %v3598_v9 = vsub.f32 %v758_v53, %v3549_v37  ;;  %v3616_v4 = vsub.f32 %v3532_v3, %v4146_v45  ;;  %v3644_v53 = vand.u32 4294901760, %v752_v51  ;;  %v912_v45 = vand.u32 4294901760, %v3621_v15  ;;  %v749_v15 = vld [vmem:[#allocation12 + $0x58] sm:$0xff] }
  0x99   :  { %2910 = vmatpush3.msra.mxu1 %v3249_v48  ;;  %2885 = vmatmul.mubr.f32.vlgmr.msra.gmra.mxu0 %v3271_v62  ;;  %v882_v48 = vand.u32 4294901760, %v3557_v35  ;;  %v3634_v34 = vsub.f32 %v757_v38, %v3583_v1  ;;  %v4156_v35 = vand.u32 4294901760, %v3602_v36  ;;  %v3649_v38 = vand.u32 4294901760, %v753_v10 }
  0x9a   :  { %2911 = vmatprep.subr.mxu1 %v4154_v0  ;;  %771 = vmatprep.subr.mxu0 %v3475_v5  ;;  %4213 = vst [vmem:[#allocation30_spill] sm:$0xff] %v3644_v53  ;;  %v4157_v54 = vand.u32 4294901760, %v3598_v9  ;;  %v906_v33 = vand.u32 4294901760, %v3616_v4  ;;  %v3712_v7 = vand.u32 4294901760, %v749_v15 }
  0x9b   :  { %2912 = vmatpush3.msra.mxu1 %v3266_v59  ;;  %773 = vmatpush1.msra.mxu0 %v3477_v6  ;;  %v3629_v59 = vsub.f32 %v756_v42, %v3585_v2  ;;  %v751_v42 = vld [vmem:[#allocation12 + $0x68] sm:$0xff]  ;;  %4214 = vst [vmem:[#allocation31_spill] sm:$0xff] %v3649_v38  ;;  %v3694_v17 = vsub.f32 %v3602_v36, %v4156_v35 }
  0x9c   :  { %2913 = vmatprep.subr.mxu1 %v4154_v0  ;;  %775 = vmatprep.subr.mxu0 %v3488_v11  ;;  %v3681_v4 = vand.u32 4294901760, %v751_v42  ;;  %4219 = vst [vmem:[#allocation36_spill] sm:$0xff] %v3712_v7 }
  0x9d   :  { %2914 = vmatpush3.msra.mxu1 %v3275_v63  ;;  %777 = vmatpush1.msra.mxu0 %v3479_v20  ;;  %v3651_v63 = vand.u32 4294901760, %v750_v21 }
  0x9e   :  { %2915 = vmatprep.subr.mxu1 %v4154_v0  ;;  %779 = vmatprep.subr.mxu0 %v3504_v27  ;;  %4217 = vst [vmem:[#allocation34_spill] sm:$0xff] %v3681_v4 }
  0x9f   :  { %4215 = vst [vmem:[#allocation32_spill] sm:$0xff] %v3651_v63  ;;  %2916 = vmatpush3.msra.mxu1 %v3290_v13  ;;  %781 = vmatpush1.msra.mxu0 %v3506_v29  ;;  %v3674_v13 = vsub.f32 %v3588_v14, %v4151_v12  ;;  %v3689_v12 = vsub.f32 %v752_v51, %v3644_v53 }
  0xa0   :  { %2917 = vmatprep.subr.mxu1 %v4154_v0  ;;  %783 = vmatprep.subr.mxu0 %v3529_v61  ;;  %v3705_v51 = vsub.f32 %v3598_v9, %v4157_v54  ;;  %v4220_v54 = vand.u32 4294901760, %v3562_v44  ;;  %v4223_v44 = vand.u32 4294901760, %v3629_v59  ;;  %v3754_v61 = vand.u32 4294901760, %v744_v39 }
  0xa1   :  { %2918 = vmatpush3.msra.mxu1 %v3302_v32  ;;  %2919 = vmatprep.mubr.msk.f32.mxu1 %vm3120_vm0, %v4154_v0  ;;  %v3700_v32 = vsub.f32 %v750_v21, %v3651_v63  ;;  %v747_v0 = vld [vmem:[#allocation12 + $0x48] sm:$0xff]  ;;  %v3716_v21 = vsub.f32 %v753_v10, %v3649_v38  ;;  %v930_v35 = vand.u32 4294901760, %v3674_v13  ;;  %v942_v10 = vand.u32 4294901760, %v3694_v17 }
  0xa2   :  { %785 = vmatpush1.msra.mxu0 %v3513_v30  ;;  %2920 = vmatmul.mubr.f32.vlgmr.msra.gmra.mxu1 %v3271_v62  ;;  %v3728_v30 = vand.u32 4294901760, %v746_v41  ;;  %v745_v62 = vld [vmem:[#allocation12 + $0x38] sm:$0xff]  ;;  %v3737_v13 = vand.u32 4294901760, %v747_v0  ;;  %v3747_v17 = vsub.f32 %v748_v25, %v3707_v47  ;;  %v3766_v29 = vsub.f32 %v749_v15, %v3712_v7 }
  0xa3   :  { %787 = vmatprep.subr.mxu0 %v3537_v28  ;;  %883 = vmatprep.subr.mxu1 %v882_v48  ;;  %v936_v28 = vand.u32 4294901760, %v3679_v56  ;;  %v4221_v48 = vand.u32 4294901760, %v3634_v34  ;;  %v3740_v56 = vsub.f32 %v751_v42, %v3681_v4  ;;  %v742_v42 = vld [vmem:[#allocation12 + $0x20] sm:$0xff] }
  0xa4   :  { %789 = vmatpush1.msra.mxu0 %v3539_v8  ;;  %889 = vmatpush1.msra.mxu1 %v4220_v54  ;;  %4222 = vst [vmem:[#allocation37_spill] sm:$0xff] %v3728_v30  ;;  %v3735_v54 = vsub.f32 %v3629_v59, %v4223_v44  ;;  %v4225_v8 = vand.u32 4294901760, %v3567_v52  ;;  %v3762_v52 = vand.u32 4294901760, %v745_v62 }
  0xa5   :  { %v3726_v55 = vsub.f32 %v3634_v34, %v4221_v48  ;;  %791 = vmatprep.subr.mxu0 %v3546_v26  ;;  %895 = vmatprep.subr.mxu1 %v894_v40  ;;  %4224 = vst [vmem:[#allocation38_spill] sm:$0xff] %v3740_v56  ;;  %v737_v48 = vld [vmem:[#allocation9] sm:$0xff]  ;;  %v948_v40 = vand.u32 4294901760, %v3705_v51  ;;  %v4226_v26 = vand.u32 4294901760, %v3655_v49  ;;  %v743_v51 = vld [vmem:[#allocation12 + $0x28] sm:$0xff] }
  0xa6   :  { %793 = vmatpush1.msra.mxu0 %v3549_v37  ;;  %901 = vmatpush1.msra.mxu1 %v4225_v8  ;;  %v4227_v37 = vand.u32 4294901760, %v3667_v31  ;;  %v960_v25 = vand.u32 4294901760, %v3735_v54  ;;  %v740_v54 = vld [vmem:[#allocation12 + $0x10] sm:$0xff] }
  0xa7   :  { %v3752_v44 = vsub.f32 %v3655_v49, %v4226_v26  ;;  %795 = vmatprep.subr.mxu0 %v3583_v1  ;;  %907 = vmatprep.subr.mxu1 %v906_v33  ;;  %v954_v26 = vand.u32 4294901760, %v3726_v55  ;;  %v3771_v33 = vsub.f32 %v746_v41, %v3728_v30  ;;  %v3787_v55 = vsub.f32 %v744_v39, %v3754_v61 }
  0xa8   :  { %v3760_v8 = vsub.f32 %v3667_v31, %v4227_v37  ;;  %797 = vmatpush1.msra.mxu0 %v3585_v2  ;;  %913 = vmatpush1.msra.mxu1 %v912_v45  ;;  %v3774_v37 = vand.u32 4294901760, %v737_v48  ;;  %v3779_v31 = vand.u32 4294901760, %v742_v42  ;;  %v741_v2 = vld [vmem:[#allocation12 + $0x18] sm:$0xff]  ;;  %v3782_v45 = vsub.f32 %v747_v0, %v3737_v13 }
  0xa9   :  { %4228 = vst [vmem:[#allocation39_spill] sm:$0xff] %v3771_v33  ;;  %799 = vmatprep.subr.mxu0 %v3609_v50  ;;  %919 = vmatprep.subr.mxu1 %v918_v46  ;;  %v966_v41 = vand.u32 4294901760, %v3752_v44  ;;  %v3789_v1 = vand.u32 4294901760, %v743_v51  ;;  %v4230_v0 = vand.u32 4294901760, %v3716_v21  ;;  %v739_v44 = vld [vmem:[#allocation12 + $0x8] sm:$0xff]  ;;  %v3799_v39 = vsub.f32 %v745_v62, %v3762_v52  ;;  %v738_v50 = vld [vmem:[#allocation12] sm:$0xff] }
  0xaa   :  { %4229 = vst [vmem:[#allocation40_spill] sm:$0xff] %v3774_v37  ;;  %801 = vmatpush1.msra.mxu0 %v3624_v18  ;;  %925 = vmatpush1.msra.mxu1 %v924_v16  ;;  %v972_v15 = vand.u32 4294901760, %v3760_v8  ;;  %v4231_v46 = vand.u32 4294901760, %v3689_v12  ;;  %v4232_v62 = vand.u32 4294901760, %v3740_v56 }
  0xab   :  { %803 = vmatprep.subr.mxu0 %v3649_v38  ;;  %931 = vmatprep.subr.mxu1 %v930_v35  ;;  %v977_v18 = vsub.f32 %v3716_v21, %v4230_v0  ;;  %v3805_v35 = vand.u32 4294901760, %v741_v2  ;;  %v3809_v0 = vsub.f32 %v737_v48, %v3774_v37  ;;  %v4233_v48 = vand.u32 4294901760, %v3700_v32 }
  0xac   :  { %805 = vmatpush1.msra.mxu0 %v3644_v53  ;;  %937 = vmatpush1.msra.mxu1 %v936_v28  ;;  %v983_v38 = vsub.f32 %v3689_v12, %v4231_v46  ;;  %v989_v16 = vsub.f32 %v3740_v56, %v4232_v62  ;;  %v3816_v28 = vsub.f32 %v742_v42, %v3779_v31  ;;  %v3818_v53 = vand.u32 4294901760, %v740_v54 }
  0xad   :  { %807 = vmatprep.subr.mxu0 %v3681_v4  ;;  %943 = vmatprep.subr.mxu1 %v942_v10  ;;  %v995_v8 = vsub.f32 %v3700_v32, %v4233_v48  ;;  %v3825_v4 = vand.u32 4294901760, %v739_v44  ;;  %v3829_v62 = vsub.f32 %v743_v51, %v3789_v1  ;;  %v978_v42 = vand.u32 4294901760, %v977_v18 }
  0xae   :  { %809 = vmatpush1.msra.mxu0 %v3651_v63  ;;  %949 = vmatpush1.msra.mxu1 %v948_v40  ;;  %v4235_v46 = vand.u32 4294901760, %v3766_v29  ;;  %v3835_v40 = vand.u32 4294901760, %v738_v50  ;;  %v984_v48 = vand.u32 4294901760, %v983_v38  ;;  %v4236_v10 = vand.u32 4294901760, %v3747_v17 }
  0xaf   :  { %4234 = vst [vmem:[#allocation41_spill] sm:$0xff] %v3825_v4  ;;  %811 = vmatprep.subr.mxu0 %v3712_v7  ;;  %955 = vmatprep.subr.mxu1 %v954_v26  ;;  %v3844_v18 = vsub.f32 %v741_v2, %v3805_v35  ;;  %v990_v26 = vand.u32 4294901760, %v989_v16  ;;  %v4237_v56 = vand.u32 4294901760, %v3782_v45  ;;  %v4238_v2 = vand.u32 4294901760, %v3771_v33 }
  0xb0   :  { %v1001_v63 = vsub.f32 %v3766_v29, %v4235_v46  ;;  %813 = vmatpush1.msra.mxu0 %v3707_v47  ;;  %961 = vmatpush1.msra.mxu1 %v960_v25  ;;  %v1007_v51 = vsub.f32 %v3747_v17, %v4236_v10  ;;  %v3848_v46 = vsub.f32 %v740_v54, %v3818_v53  ;;  %v996_v10 = vand.u32 4294901760, %v995_v8 }
  0xb1   :  { %815 = vmatprep.subr.mxu0 %v3737_v13  ;;  %967 = vmatprep.subr.mxu1 %v966_v41  ;;  %v1013_v38 = vsub.f32 %v3782_v45, %v4237_v56  ;;  %v1019_v7 = vsub.f32 %v3771_v33, %v4238_v2  ;;  %v3860_v16 = vsub.f32 %v739_v44, %v3825_v4  ;;  %v4240_v25 = vand.u32 4294901760, %v3799_v39 }
  0xb2   :  { %817 = vmatpush1.msra.mxu0 %v3728_v30  ;;  %973 = vmatpush1.msra.mxu1 %v972_v15  ;;  %v1002_v54 = vand.u32 4294901760, %v1001_v63  ;;  %v3864_v56 = vsub.f32 %v738_v50, %v3835_v40  ;;  %v1008_v2 = vand.u32 4294901760, %v1007_v51  ;;  %v4241_v44 = vand.u32 4294901760, %v3809_v0 }
  0xb3   :  { %819 = vmatprep.subr.mxu0 %v3762_v52  ;;  %979 = vmatprep.subr.mxu1 %v978_v42  ;;  %v1025_v15 = vsub.f32 %v3799_v39, %v4240_v25  ;;  %v1014_v50 = vand.u32 4294901760, %v1013_v38  ;;  %v4242_v63 = vand.u32 4294901760, %v3787_v55  ;;  %v4243_v51 = vand.u32 4294901760, %v3829_v62 }
  0xb4   :  { %4239 = vst [vmem:[#allocation42_spill] sm:$0xff] %v3864_v56  ;;  %821 = vmatpush1.msra.mxu0 %v3754_v61  ;;  %985 = vmatpush1.msra.mxu1 %v984_v48  ;;  %v870_v41 = vsub.f32 %v3809_v0, %v4241_v44  ;;  %v1020_v48 = vand.u32 4294901760, %v1019_v7  ;;  %v4244_v38 = vand.u32 4294901760, %v3816_v28  ;;  %v4247_v8 = vand.u32 4294901760, %v3860_v16 }
  0xb5   :  { %823 = vmatprep.subr.mxu0 %v3789_v1  ;;  %991 = vmatprep.subr.mxu1 %v990_v26  ;;  %v1031_v25 = vsub.f32 %v3787_v55, %v4242_v63  ;;  %v1037_v44 = vsub.f32 %v3829_v62, %v4243_v51  ;;  %v1026_v26 = vand.u32 4294901760, %v1025_v15 }
  0xb6   :  { %825 = vmatpush1.msra.mxu0 %v3779_v31  ;;  %997 = vmatpush1.msra.mxu1 %v996_v10  ;;  %v1043_v63 = vsub.f32 %v3816_v28, %v4244_v38  ;;  %v871_v7 = vand.u32 4294901760, %v870_v41  ;;  %v4245_v10 = vand.u32 4294901760, %v3844_v18  ;;  %v1061_v41 = vsub.f32 %v3860_v16, %v4247_v8 }
  0xb7   :  { %827 = vmatprep.subr.mxu0 %v3805_v35  ;;  %1003 = vmatprep.subr.mxu1 %v1002_v54  ;;  %v1032_v42 = vand.u32 4294901760, %v1031_v25  ;;  %v4246_v54 = vand.u32 4294901760, %v3848_v46  ;;  %v1038_v38 = vand.u32 4294901760, %v1037_v44 }
  0xb8   :  { %829 = vmatpush1.msra.mxu0 %v3818_v53  ;;  %1009 = vmatpush1.msra.mxu1 %v1008_v2  ;;  %v1049_v51 = vsub.f32 %v3844_v18, %v4245_v10  ;;  %v4248_v2 = vmov 0.0   ;;  %v1044_v10 = vand.u32 4294901760, %v1043_v63  ;;  %v1062_v8 = vand.u32 4294901760, %v1061_v41  ;;  %v4253_v63 = vld [vmem:[#allocation20_spill] sm:$0xff]  ;;  %v4259_v41 = vld [vmem:[#allocation26_spill] sm:$0xff] }
  0xb9   :  { %831 = vmatprep.subr.mxu0 %v3825_v4  ;;  %1015 = vmatprep.subr.mxu1 %v1014_v50  ;;  %v1055_v15 = vsub.f32 %v3848_v46, %v4246_v54  ;;  %v4249_v4 = vand.u32 4294901760, %v3864_v56  ;;  %v4256_v54 = vld [vmem:[#allocation38_spill] sm:$0xff]  ;;  %735 = vst.msk [vmem:[#allocation4] sm:$0xff] %vm733_vm1, %v4248_v2 }
  0xba   :  { %833 = vmatpush1.msra.mxu0 %v3835_v40  ;;  %1021 = vmatpush1.msra.mxu1 %v1020_v48  ;;  %v1050_v25 = vand.u32 4294901760, %v1049_v51  ;;  %v4255_v51 = vld [vmem:[#allocation23_spill] sm:$0xff] }
  0xbb   :  { %866 = vmatprep.mubr.f32.mxu0 %v4248_v2  ;;  %1027 = vmatprep.subr.mxu1 %v1026_v26  ;;  %v1067_v50 = vsub.f32 %v3864_v56, %v4249_v4  ;;  %v1056_v48 = vand.u32 4294901760, %v1055_v15  ;;  %v4250_v4 = vld [vmem:[#allocation19_spill] sm:$0xff]  ;;  %v4252_v26 = vld [vmem:[#allocation33_spill] sm:$0xff]  ;;  %v4257_v15 = vld [vmem:[#allocation24_spill] sm:$0xff] }
  0xbc   :  { %1112 = vmatprep.subr.mxu0 %v3500_v24  ;;  %872 = vmatmul.mubr.f32.vlgmr.msra.gmra.mxu0 %v871_v7  ;;  %v4254_v7 = vld [vmem:[#allocation22_spill] sm:$0xff] }
  0xbd   :  { %1033 = vmatpush1.msra.mxu1 %v1032_v42  ;;  %1115 = vmatpush1.msra.mxu0 %v3494_v22  ;;  %v1068_v44 = vand.u32 4294901760, %v1067_v50  ;;  %v4251_v42 = vld [vmem:[#allocation21_spill] sm:$0xff]  ;;  %v4261_v50 = vld [vmem:[#allocation28_spill] sm:$0xff] }
  0xbe   :  { %1039 = vmatprep.subr.mxu1 %v1038_v38  ;;  %1118 = vmatprep.subr.mxu0 %v3516_v43  ;;  %v4258_v38 = vld [vmem:[#allocation25_spill] sm:$0xff] }
  0xbf   :  { %1045 = vmatpush1.msra.mxu1 %v1044_v10  ;;  %1121 = vmatpush1.msra.mxu0 %v3497_v23  ;;  %v4260_v10 = vld [vmem:[#allocation27_spill] sm:$0xff] }
  0xc0   :  { %1051 = vmatprep.subr.mxu1 %v1050_v25  ;;  %1124 = vmatprep.subr.mxu0 %v3532_v3  ;;  %v4262_v25 = vld [vmem:[#allocation29_spill] sm:$0xff] }
  0xc1   :  { %1057 = vmatpush1.msra.mxu1 %v1056_v48  ;;  %1127 = vmatpush1.msra.mxu0 %v3527_v57  ;;  %v4263_v48 = vld [vmem:[#allocation31_spill] sm:$0xff] }
  0xc2   :  { %1063 = vmatprep.subr.mxu1 %v1062_v8  ;;  %1130 = vmatprep.subr.mxu0 %v3574_v58  ;;  %v4264_v8 = vld [vmem:[#allocation30_spill] sm:$0xff] }
  0xc3   :  { %1069 = vmatpush1.msra.mxu1 %v1068_v44  ;;  %1102 = vmatprep.mubr.f32.mxu1 %v4248_v2  ;;  %v4265_v44 = vld [vmem:[#allocation34_spill] sm:$0xff] }
  0xc4   :  { %1133 = vmatpush1.msra.mxu0 %v3544_v19  ;;  %1104 = vmatmul.mubr.f32.vlgmr.msra.gmra.mxu1 %v3774_v37  ;;  %v4266_v37 = vld [vmem:[#allocation32_spill] sm:$0xff] }
  0xc5   :  { %1136 = vmatprep.subr.mxu0 %v3588_v14  ;;  %1248 = vmatprep.subr.mxu1 %v3475_v5 }
  0xc6   :  { %1139 = vmatpush1.msra.mxu0 %v3581_v60  ;;  %1250 = vmatpush1.msra.mxu1 %v3477_v6 }
  0xc7   :  { %1142 = vmatprep.subr.mxu0 %v3602_v36  ;;  %1252 = vmatprep.subr.mxu1 %v3488_v11 }
  0xc8   :  { %1145 = vmatpush1.msra.mxu0 %v3598_v9  ;;  %1254 = vmatpush1.msra.mxu1 %v3479_v20 }
  0xc9   :  { %1148 = vmatprep.subr.mxu0 %v3634_v34  ;;  %1256 = vmatprep.subr.mxu1 %v3504_v27 }
  0xca   :  { %1151 = vmatpush1.msra.mxu0 %v3629_v59  ;;  %1258 = vmatpush1.msra.mxu1 %v4250_v4 }
  0xcb   :  { %1154 = vmatprep.subr.mxu0 %v3655_v49  ;;  %1260 = vmatprep.subr.mxu1 %v4251_v42 }
  0xcc   :  { %1157 = vmatpush1.msra.mxu0 %v4252_v26  ;;  %1262 = vmatpush1.msra.mxu1 %v4253_v63 }
  0xcd   :  { %1160 = vmatprep.subr.mxu0 %v3716_v21  ;;  %1264 = vmatprep.subr.mxu1 %v4254_v7 }
  0xce   :  { %1163 = vmatpush1.msra.mxu0 %v3689_v12  ;;  %1266 = vmatpush1.msra.mxu1 %v4255_v51 }
  0xcf   :  { %1166 = vmatprep.subr.mxu0 %v4256_v54  ;;  %1268 = vmatprep.subr.mxu1 %v4257_v15 }
  0xd0   :  { %1169 = vmatpush1.msra.mxu0 %v3700_v32  ;;  %1270 = vmatpush1.msra.mxu1 %v4258_v38 }
  0xd1   :  { %1172 = vmatprep.subr.mxu0 %v3766_v29  ;;  %1272 = vmatprep.subr.mxu1 %v4259_v41 }
  0xd2   :  { %1175 = vmatpush1.msra.mxu0 %v3747_v17  ;;  %1274 = vmatpush1.msra.mxu1 %v4260_v10 }
  0xd3   :  { %1178 = vmatprep.subr.mxu0 %v3782_v45  ;;  %1276 = vmatprep.subr.mxu1 %v4261_v50 }
  0xd4   :  { %1181 = vmatpush1.msra.mxu0 %v3771_v33  ;;  %1278 = vmatpush1.msra.mxu1 %v4262_v25  ;;  %v4267_v33 = vld [vmem:[#allocation36_spill] sm:$0xff] }
  0xd5   :  { %1184 = vmatprep.subr.mxu0 %v3799_v39  ;;  %1280 = vmatprep.subr.mxu1 %v4263_v48 }
  0xd6   :  { %1187 = vmatpush1.msra.mxu0 %v3787_v55  ;;  %1282 = vmatpush1.msra.mxu1 %v4264_v8 }
  0xd7   :  { %1190 = vmatprep.subr.mxu0 %v3829_v62  ;;  %1284 = vmatprep.subr.mxu1 %v4265_v44 }
  0xd8   :  { %1193 = vmatpush1.msra.mxu0 %v3816_v28  ;;  %1286 = vmatpush1.msra.mxu1 %v4266_v37 }
  0xd9   :  { %1196 = vmatprep.subr.mxu0 %v3844_v18  ;;  %1288 = vmatprep.subr.mxu1 %v4267_v33  ;;  %v4268_v33 = vand.u32 4294901760, %v3500_v24  ;;  %v4272_v24 = vand.u32 4294901760, %v3532_v3  ;;  %v4278_v3 = vand.u32 4294901760, %v3588_v14  ;;  %v4282_v14 = vand.u32 4294901760, %v3634_v34 }
  0xda   :  { %1199 = vmatpush1.msra.mxu0 %v3848_v46  ;;  %1290 = vmatpush1.msra.mxu1 %v3707_v47  ;;  %v4269_v47 = vand.u32 4294901760, %v3494_v22  ;;  %v4273_v22 = vand.u32 4294901760, %v3527_v57  ;;  %v4279_v57 = vand.u32 4294901760, %v3581_v60  ;;  %v4289_v60 = vand.u32 4294901760, %v3700_v32 }
  0xdb   :  { %1202 = vmatprep.subr.mxu0 %v3860_v16  ;;  %1292 = vmatprep.subr.mxu1 %v3737_v13  ;;  %v4296_v32 = vand.u32 4294901760, %v3787_v55  ;;  %v4301_v55 = vand.u32 4294901760, %v3848_v46 }
  0xdc   :  { %1205 = vmatpush1.msra.mxu0 %v3864_v56  ;;  %1238 = vmatprep.mubr.f32.mxu0 %v4248_v2  ;;  %v4270_v56 = vand.u32 4294901760, %v3516_v43  ;;  %v4275_v43 = vand.u32 4294901760, %v3574_v58  ;;  %v4280_v58 = vand.u32 4294901760, %v3602_v36  ;;  %v4291_v36 = vand.u32 4294901760, %v3747_v17 }
  0xdd   :  { %1294 = vmatpush1.msra.mxu1 %v3728_v30  ;;  %1241 = vmatmul.mubr.f32.vlgmr.msra.gmra.mxu0 %v3809_v0  ;;  %v4271_v30 = vand.u32 4294901760, %v3497_v23  ;;  %v4276_v23 = vand.u32 4294901760, %v3544_v19  ;;  %v4281_v19 = vand.u32 4294901760, %v3598_v9  ;;  %v4290_v9 = vand.u32 4294901760, %v3766_v29 }
  0xde   :  { %1296 = vmatprep.subr.mxu1 %v3762_v52  ;;  %1356 = vmatprep.subr.mxu0 %v4268_v33  ;;  %v4295_v29 = vand.u32 4294901760, %v3799_v39  ;;  %v4298_v17 = vand.u32 4294901760, %v3816_v28  ;;  %v4299_v33 = vand.u32 4294901760, %v3844_v18  ;;  %v4302_v39 = vld [vmem:[#allocation35_spill] sm:$0xff]  ;;  %v4307_v18 = vld [vmem:[#allocation40_spill] sm:$0xff] }
  0xdf   :  { %1298 = vmatpush1.msra.mxu1 %v3754_v61  ;;  %1360 = vmatpush1.msra.mxu0 %v4269_v47  ;;  %v4274_v47 = vld [vmem:[#allocation41_spill] sm:$0xff] }
  0xe0   :  { %1300 = vmatprep.subr.mxu1 %v3789_v1  ;;  %1364 = vmatprep.subr.mxu0 %v4270_v56 }
  0xe1   :  { %1302 = vmatpush1.msra.mxu1 %v3779_v31  ;;  %1368 = vmatpush1.msra.mxu0 %v4271_v30  ;;  %v4277_v30 = vand.u32 4294901760, %v3809_v0  ;;  %v4303_v0 = vand.u32 4294901760, %v3860_v16 }
  0xe2   :  { %1304 = vmatprep.subr.mxu1 %v3805_v35  ;;  %1372 = vmatprep.subr.mxu0 %v4272_v24 }
  0xe3   :  { %1306 = vmatpush1.msra.mxu1 %v3818_v53  ;;  %1376 = vmatpush1.msra.mxu0 %v4273_v22 }
  0xe4   :  { %1308 = vmatprep.subr.mxu1 %v4274_v47  ;;  %1380 = vmatprep.subr.mxu0 %v4275_v43 }
  0xe5   :  { %1310 = vmatpush1.msra.mxu1 %v3835_v40  ;;  %1343 = vmatprep.mubr.f32.mxu1 %v4248_v2 }
  0xe6   :  { %1384 = vmatpush1.msra.mxu0 %v4276_v23  ;;  %1347 = vmatmul.mubr.f32.vlgmr.msra.gmra.mxu1 %v4277_v30 }
  0xe7   :  { %1388 = vmatprep.subr.mxu0 %v4278_v3  ;;  %1522 = vmatprep.subr.mxu1 %v3475_v5  ;;  %v4283_v5 = vand.u32 4294901760, %v3629_v59  ;;  %v4292_v59 = vand.u32 4294901760, %v3782_v45  ;;  %v4300_v45 = vld [vmem:[#allocation36_spill] sm:$0xff] }
  0xe8   :  { %1392 = vmatpush1.msra.mxu0 %v4279_v57  ;;  %1524 = vmatpush1.msra.mxu1 %v3477_v6  ;;  %v4284_v6 = vand.u32 4294901760, %v3655_v49  ;;  %v4288_v49 = vand.u32 4294901760, %v4256_v54 }
  0xe9   :  { %1396 = vmatprep.subr.mxu0 %v4280_v58  ;;  %1526 = vmatprep.subr.mxu1 %v3488_v11  ;;  %v4285_v11 = vand.u32 4294901760, %v4252_v26 }
  0xea   :  { %1400 = vmatpush1.msra.mxu0 %v4281_v19  ;;  %1528 = vmatpush1.msra.mxu1 %v3479_v20  ;;  %v4286_v20 = vand.u32 4294901760, %v3716_v21  ;;  %v4297_v21 = vand.u32 4294901760, %v3829_v62  ;;  %v4304_v62 = vld [vmem:[#allocation42_spill] sm:$0xff] }
  0xeb   :  { %1404 = vmatprep.subr.mxu0 %v4282_v14  ;;  %1530 = vmatprep.subr.mxu1 %v3504_v27  ;;  %v4287_v27 = vand.u32 4294901760, %v3689_v12  ;;  %v4293_v12 = vld [vmem:[#allocation39_spill] sm:$0xff]  ;;  %v4305_v28 = vand.u32 4294901760, %v4304_v62 }
  0xec   :  { %1408 = vmatpush1.msra.mxu0 %v4283_v5  ;;  %1532 = vmatpush1.msra.mxu1 %v4250_v4  ;;  %v4294_v34 = vand.u32 4294901760, %v4293_v12 }
  0xed   :  { %1412 = vmatprep.subr.mxu0 %v4284_v6  ;;  %1534 = vmatprep.subr.mxu1 %v4251_v42 }
  0xee   :  { %1416 = vmatpush1.msra.mxu0 %v4285_v11  ;;  %1536 = vmatpush1.msra.mxu1 %v4253_v63 }
  0xef   :  { %1420 = vmatprep.subr.mxu0 %v4286_v20  ;;  %1538 = vmatprep.subr.mxu1 %v4254_v7 }
  0xf0   :  { %1424 = vmatpush1.msra.mxu0 %v4287_v27  ;;  %1540 = vmatpush1.msra.mxu1 %v4255_v51 }
  0xf1   :  { %1428 = vmatprep.subr.mxu0 %v4288_v49  ;;  %1542 = vmatprep.subr.mxu1 %v4257_v15 }
  0xf2   :  { %1432 = vmatpush1.msra.mxu0 %v4289_v60  ;;  %1544 = vmatpush1.msra.mxu1 %v4258_v38 }
  0xf3   :  { %1436 = vmatprep.subr.mxu0 %v4290_v9  ;;  %1546 = vmatprep.subr.mxu1 %v4259_v41 }
  0xf4   :  { %1440 = vmatpush1.msra.mxu0 %v4291_v36  ;;  %1548 = vmatpush1.msra.mxu1 %v4260_v10 }
  0xf5   :  { %1444 = vmatprep.subr.mxu0 %v4292_v59  ;;  %1550 = vmatprep.subr.mxu1 %v4261_v50 }
  0xf6   :  { %1448 = vmatpush1.msra.mxu0 %v4294_v34  ;;  %1552 = vmatpush1.msra.mxu1 %v4262_v25 }
  0xf7   :  { %1452 = vmatprep.subr.mxu0 %v4295_v29  ;;  %1554 = vmatprep.subr.mxu1 %v4263_v48 }
  0xf8   :  { %1456 = vmatpush1.msra.mxu0 %v4296_v32  ;;  %1556 = vmatpush1.msra.mxu1 %v4264_v8 }
  0xf9   :  { %1460 = vmatprep.subr.mxu0 %v4297_v21  ;;  %1558 = vmatprep.subr.mxu1 %v4265_v44 }
  0xfa   :  { %1464 = vmatpush1.msra.mxu0 %v4298_v17  ;;  %1560 = vmatpush1.msra.mxu1 %v4266_v37  ;;  %v4306_v37 = vld [vmem:[#allocation37_spill] sm:$0xff] }
  0xfb   :  { %1468 = vmatprep.subr.mxu0 %v4299_v33  ;;  %1562 = vmatprep.subr.mxu1 %v4300_v45  ;;  %v3121_v45 = vmov -inf  }
  0xfc   :  { %1472 = vmatpush1.msra.mxu0 %v4301_v55  ;;  %1564 = vmatpush1.msra.mxu1 %v4302_v39  ;;  %734 = vst.msk [vmem:[#allocation3] sm:$0xff] %vm733_vm1, %v3121_v45 }
  0xfd   :  { %1476 = vmatprep.subr.mxu0 %v4303_v0  ;;  %1566 = vmatprep.subr.mxu1 %v3737_v13 }
  0xfe   :  { %1480 = vmatpush1.msra.mxu0 %v4305_v28  ;;  %1513 = vmatprep.mubr.f32.mxu0 %v4248_v2 }
  0xff   :  { %1568 = vmatpush1.msra.mxu1 %v4306_v37  ;;  %1515 = vmatmul.mubr.f32.vlgmr.msra.gmra.mxu0 %v4307_v18 }
 0x100   :  { %1570 = vmatprep.subr.mxu1 %v3762_v52  ;;  %1617 = vmatprep.mubr.f32.mxu1 %v4248_v2 }
 0x101   :  { %1572 = vmatpush1.msra.mxu1 %v3754_v61  ;;  %2922 = vmatprep.subr.mxu0 %v4248_v2 }
 0x102   :  { %1574 = vmatprep.subr.mxu1 %v3789_v1  ;;  %2924 = vmatprep.mubr.msk.f32.mxu0 %vm3120_vm0, %v4248_v2 }
 0x103   :  { %1576 = vmatpush1.msra.mxu1 %v3779_v31 }
 0x104   :  { %1578 = vmatprep.subr.mxu1 %v3805_v35 }
 0x105   :  { %1580 = vmatpush1.msra.mxu1 %v3818_v53 }
 0x106   :  { %1582 = vmatprep.subr.mxu1 %v4274_v47 }
 0x107   :  { %1584 = vmatpush1.msra.mxu1 %v3835_v40 }
 0x108   :  { %1619 = vmatmul.mubr.f32.vlgmr.msra.gmra.mxu1 %v4307_v18  ;;  %2927 = vmatprep.subr.mxu1 %v4248_v2 }
 0x109   :  { %2929 = vmatprep.mubr.msk.f32.mxu1 %vm3120_vm0, %v4248_v2 }
 0x117   :  { %v177_v61 = vpop.f32.mrf.mxu0 }
 0x119   :  { %v2746_v1 = vpop.f32.mrf.mxu0 }
 0x11e   :  { %v328_v13 = vpop.f32.mrf.mxu1 }
 0x11f   :  { %v329_v52 = vadd.f32 %v328_v13, %v177_v61 }
 0x120   :  { %v2781_v31 = vpop.f32.mrf.mxu1 }
 0x137   :  { %v432_v46 = vpop.f32.mrf.mxu0 }
 0x138   :  { %v433_v35 = vadd.f32 %v432_v46, %v329_v52 }
 0x139   :  { %v2816_v16 = vpop.f32.mrf.mxu0 }
 0x140   :  { %v521_v53 = vpop.f32.mrf.mxu1 }
 0x141   :  { %v522_v56 = vadd.f32 %v521_v53, %v433_v35 }
 0x142   :  { %v2851_v4 = vpop.f32.mrf.mxu1 }
 0x159   :  { %v640_v42 = vpop.f32.mrf.mxu0 }
 0x15a   :  { %v641_v40 = vadd.f32 %v640_v42, %v522_v56  ;;  %v3122_v42 = vmov 0  }
 0x15b   :  { %v2886_v26 = vpop.f32.mrf.mxu0  ;;  %2995 = vset.pattern.permute.xlu0 %v3122_v42  ;;  %2996 = vset.pattern.permute.xlu1 %v3122_v42 }
 0x162   :  { %v727_v63 = vpop.f32.mrf.mxu1 }
 0x163   :  { %v728_v7 = vadd.f32 %v727_v63, %v641_v40  ;;  %v2072_v40 = vld [vmem:[#allocation3] sm:$0xff] }
 0x164   :  { %v2921_v51 = vpop.f32.mrf.mxu1 }
 0x165   :  { %v731_v15 = vmul.f32 0.25, %v728_v7 }
 0x167   :  { %v1692_v50 = vand.u32 4294901760, %v731_v15 }
 0x169   :  { %v1693_v24 = vsub.f32 %v731_v15, %v1692_v50 }
 0x16b   :  { %v1694_v57 = vand.u32 4294901760, %v1693_v24 }
 0x16d   :  { %v1695_v20 = vsub.f32 %v1693_v24, %v1694_v57 }
 0x16f   :  { %v1696_v36 = vand.u32 4294901760, %v1695_v20 }
 0x17c   :  { %v873_v54 = vpop.f32.mrf.mxu0 }
 0x17e   :  { %v875_v38 = vpop.f32.mrf.mxu0 }
 0x184   :  { %v1105_v41 = vpop.f32.mrf.mxu1 }
 0x185   :  { %v1106_v44 = vadd.f32 %v1105_v41, %v873_v54 }
 0x186   :  { %v1107_v25 = vpop.f32.mrf.mxu1 }
 0x187   :  { %v1108_v47 = vadd.f32 %v1107_v25, %v875_v38 }
 0x19d   :  { %v1242_v10 = vpop.f32.mrf.mxu0 }
 0x19e   :  { %v1243_v43 = vadd.f32 %v1242_v10, %v1106_v44 }
 0x19f   :  { %v1244_v48 = vpop.f32.mrf.mxu0 }
 0x1a0   :  { %v1245_v30 = vadd.f32 %v1244_v48, %v1108_v47  ;;  %v2089_v47 = vld [vmem:[#allocation4] sm:$0xff] }
 0x1a6   :  { %v1348_v8 = vpop.f32.mrf.mxu1 }
 0x1a7   :  { %v1349_v3 = vadd.f32 %v1348_v8, %v1243_v43 }
 0x1a8   :  { %v1350_v23 = vpop.f32.mrf.mxu1 }
 0x1a9   :  { %v1351_v19 = vadd.f32 %v1350_v23, %v1245_v30 }
 0x1bf   :  { %v1516_v22 = vpop.f32.mrf.mxu0 }
 0x1c0   :  { %v1517_v14 = vadd.f32 %v1516_v22, %v1349_v3 }
 0x1c1   :  { %v1518_v58 = vpop.f32.mrf.mxu0 }
 0x1c2   :  { %v1519_v6 = vadd.f32 %v1518_v58, %v1351_v19 }
 0x1c8   :  { %v1620_v5 = vpop.f32.mrf.mxu1 }
 0x1c9   :  { %v1621_v11 = vadd.f32 %v1620_v5, %v1517_v14 }
 0x1ca   :  { %v1622_v27 = vpop.f32.mrf.mxu1 }
 0x1cb   :  { %v1657_v49 = vand.u32 4294901760, %v1621_v11  ;;  %v1623_v60 = vadd.f32 %v1622_v27, %v1519_v6 }
 0x1cd   :  { %v1734_v9 = vsub.f32 %v1621_v11, %v1657_v49  ;;  %2923 = vmatpush3.xpose.msra.mxu0 %v1657_v49  ;;  %v4084_v12 = vand.u32 4294901760, %v1623_v60 }
 0x1ce   :  { %2932 = vmatprep.subr.mxu0 %v4248_v2 }
 0x1cf   :  { %v1735_v59 = vand.u32 4294901760, %v1734_v9  ;;  %v4090_v29 = vsub.f32 %v1623_v60, %v4084_v12 }
 0x1d0   :  { %2925 = vmatmul.mubr.f32.vlgmr.msra.gmra.mxu0 %v1696_v36 }
 0x1d1   :  { %v1736_v34 = vsub.f32 %v1734_v9, %v1735_v59  ;;  %2933 = vmatpush3.xpose.msra.mxu0 %v1734_v9  ;;  %2934 = vmatprep.mubr.msk.f32.mxu0 %vm3120_vm0, %v4248_v2  ;;  %v2216_v21 = vand.u32 4294901760, %v4090_v29 }
 0x1d2   :  { %2942 = vmatprep.subr.mxu0 %v4248_v2 }
 0x1d3   :  { %v1737_v32 = vand.u32 4294901760, %v1736_v34  ;;  %v2217_v17 = vsub.f32 %v4090_v29, %v2216_v21 }
 0x1d4   :  { %2935 = vmatmul.mubr.f32.vlgmr.msra.gmra.mxu0 %v1693_v24 }
 0x1d5   :  { %2928 = vmatpush3.xpose.msra.mxu1 %v1737_v32  ;;  %2943 = vmatpush3.xpose.msra.mxu0 %v1735_v59  ;;  %v2218_v33 = vand.u32 4294901760, %v2217_v17 }
 0x1d6   :  { %2944 = vmatprep.mubr.msk.f32.mxu0 %vm3120_vm0, %v4248_v2  ;;  %2937 = vmatprep.subr.mxu1 %v4248_v2 }
 0x1d7   :  { %2952 = vmatprep.subr.mxu0 %v4248_v2 }
 0x1d8   :  { %2930 = vmatmul.mubr.f32.vlgmr.msra.gmra.mxu1 %v1692_v50  ;;  %2945 = vmatmul.mubr.f32.vlgmr.msra.gmra.mxu0 %v1692_v50 }
 0x1d9   :  { %2938 = vmatpush3.xpose.msra.mxu1 %v1657_v49  ;;  %2953 = vmatpush3.msra.mxu0 %v4084_v12 }
 0x1da   :  { %2939 = vmatprep.mubr.msk.f32.mxu1 %vm3120_vm0, %v4248_v2  ;;  %2947 = vmatprep.subr.mxu1 %v4248_v2 }
 0x1db   :  { %2954 = vmatprep.mubr.msk.f32.mxu0 %vm3120_vm0, %v4248_v2  ;;  %2962 = vmatprep.subr.mxu0 %v4248_v2 }
 0x1dc   :  { %2940 = vmatmul.mubr.f32.vlgmr.msra.gmra.mxu1 %v1694_v57 }
 0x1dd   :  { %2948 = vmatpush3.xpose.msra.mxu1 %v1657_v49  ;;  %2949 = vmatprep.mubr.msk.f32.mxu1 %vm3120_vm0, %v4248_v2 }
 0x1de   :  { %2957 = vmatprep.subr.mxu1 %v4248_v2 }
 0x1e0   :  { %2950 = vmatmul.mubr.f32.vlgmr.msra.gmra.mxu1 %v1692_v50 }
 0x1e1   :  { %2958 = vmatpush3.msra.mxu1 %v2218_v33  ;;  %2959 = vmatprep.mubr.msk.f32.mxu1 %vm3120_vm0, %v4248_v2 }
 0x1e2   :  { %2967 = vmatprep.subr.mxu1 %v4248_v2 }
 0x290   :  { %v1698_v55 = vpop.f32.mrf.mxu0 }
 0x292   :  { %v2926_v39 = vpop.f32.mrf.mxu0 }
 0x294   :  { %v1848_v0 = vpop.f32.mrf.mxu0 }
 0x296   :  { %v2936_v62 = vpop.f32.mrf.mxu0 }
 0x298   :  { %v1774_v28 = vpop.f32.mrf.mxu1  ;;  %v1996_v37 = vpop.f32.mrf.mxu0 }
 0x299   :  { %v1775_v18 = vadd.f32 %v1774_v28, %v1698_v55 }
 0x29a   :  { %v2931_v61 = vpop.f32.mrf.mxu1  ;;  %v2946_v1 = vpop.f32.mrf.mxu0 }
 0x29b   :  { %v1849_v13 = vadd.f32 %v1848_v0, %v1775_v18 }
 0x29c   :  { %v1922_v52 = vpop.f32.mrf.mxu1 }
 0x29d   :  { %v1923_v31 = vadd.f32 %v1922_v52, %v1849_v13 }
 0x29e   :  { %v2941_v46 = vpop.f32.mrf.mxu1 }
 0x29f   :  { %v1997_v35 = vadd.f32 %v1996_v37, %v1923_v31 }
 0x2a0   :  { %v2068_v16 = vpop.f32.mrf.mxu1 }
 0x2a1   :  { %v2069_v53 = vadd.f32 %v2068_v16, %v1997_v35 }
 0x2a2   :  { %v2951_v56 = vpop.f32.mrf.mxu1 }
 0x2a3   :  { %v2074_v4 = vsel %vm2073_vm2, %v2069_v53, -inf }
 0x2a4   :  { %2075 = vmax.xlane.f32.xlu0 %v2074_v4 }
 0x32d   :  { %v2076_v26 = vpop.xlane.xlu0 %2075 }
 0x32e   :  { %v2077_v63 = vmax.f32 %v2072_v40, %v2076_v26 }
 0x330   :  { %v2078_v7 = vsub.f32 %v2072_v40, %v2077_v63  ;;  %2555 = vst.msk [vmem:[#allocation3] sm:$0xff] %vm733_vm1, %v2077_v63  ;;  %2083 = vperm.xlu0 %2995, %v2077_v63  }
 0x332   :  { %v2079_v24 = vmul.f32 1.442695, %v2078_v7 }
 0x3ab   :  { %v2084_v51 = vpop.permute.xlu0 %2083 }
 0x3ac   :  { %v2086_v54 = vsub.f32 %v2069_v53, %v2084_v51 }
 0x3ae   :  { %v2087_v15 = vmul.f32 1.442695, %v2086_v54 }
 0x3b0   :  { %2997 = vpow2.f32 %v2087_v15 }
 0x3b1   :  { %2999 = vpow2.f32 %v2079_v24 }
 0x3bd   :  { %v2998_v38 = vpop.eup %2997 }
 0x3be   :  { %v2091_v41 = vsel %vm2073_vm2, %v2998_v38, 0.0  ;;  %v2105_v10 = vsel %vm2073_vm2, %v2998_v38, 0  ;;  %v3000_v22 = vpop.eup %2999 }
 0x3bf   :  { %2092 = vadd.xlane.f32.xlu1 %v2091_v41  ;;  %v2173_v50 = vand.u32 4294901760, %v2105_v10  ;;  %v2090_v43 = vmul.f32 %v3000_v22, %v2089_v47 }
 0x3c1   :  { %v2174_v25 = vsub.f32 %v2105_v10, %v2173_v50  ;;  %2960 = vmatmul.mubr.f32.vlgmr.msra.gmra.mxu1 %v2173_v50 }
 0x3c2   :  { %2968 = vmatpush3.msra.mxu1 %v4084_v12  ;;  %2969 = vmatprep.mubr.msk.f32.mxu1 %vm3120_vm0, %v4248_v2 }
 0x3c3   :  { %2977 = vmatprep.subr.mxu1 %v4248_v2  ;;  %v2175_v48 = vand.u32 4294901760, %v2174_v25 }
 0x3c5   :  { %2970 = vmatmul.mubr.f32.vlgmr.msra.gmra.mxu1 %v2175_v48  ;;  %v2176_v8 = vsub.f32 %v2174_v25, %v2175_v48 }
 0x3c6   :  { %2978 = vmatpush3.msra.mxu1 %v4084_v12  ;;  %2979 = vmatprep.mubr.msk.f32.mxu1 %vm3120_vm0, %v4248_v2 }
 0x3c7   :  { %v2177_v44 = vand.u32 4294901760, %v2176_v8 }
 0x3c9   :  { %2955 = vmatmul.mubr.f32.vlgmr.msra.gmra.mxu0 %v2177_v44  ;;  %2980 = vmatmul.mubr.f32.vlgmr.msra.gmra.mxu1 %v2173_v50 }
 0x3ca   :  { %2963 = vmatpush3.msra.mxu0 %v4090_v29  ;;  %2964 = vmatprep.mubr.msk.f32.mxu0 %vm3120_vm0, %v4248_v2 }
 0x3cb   :  { %2972 = vmatprep.subr.mxu0 %v4248_v2 }
 0x3cd   :  { %2965 = vmatmul.mubr.f32.vlgmr.msra.gmra.mxu0 %v2174_v25 }
 0x3ce   :  { %2973 = vmatpush3.msra.mxu0 %v2216_v21  ;;  %2974 = vmatprep.mubr.msk.f32.mxu0 %vm3120_vm0, %v4248_v2 }
 0x3d1   :  { %2975 = vmatmul.mubr.f32.vlgmr.msra.gmra.mxu0 %v2173_v50 }
 0x448   :  { %v2093_v23 = vpop.xlane.xlu1 %2092 }
 0x449   :  { %v2094_v30 = vadd.f32 %v2093_v23, %v2090_v43 }
 0x44b   :  { %2096 = vst.msk [vmem:[#allocation4] sm:$0xff] %vm733_vm1, %v2094_v30 }
 0x452   :  { %v2560_v3 = vld [vmem:[#allocation4] sm:$0xff] }
 0x453   :  { %2563 = vperm.xlu1 %2996, %v2560_v3  }
 0x457   :  { %2100 = vperm.xlu1 %2996, %v3000_v22  }
 0x481   :  { %v2255_v57 = vpop.f32.mrf.mxu1 }
 0x483   :  { %v2961_v58 = vpop.f32.mrf.mxu1 }
 0x485   :  { %v2403_v19 = vpop.f32.mrf.mxu1 }
 0x487   :  { %v2971_v14 = vpop.f32.mrf.mxu1 }
 0x489   :  { %v2179_v5 = vpop.f32.mrf.mxu0  ;;  %v2549_v6 = vpop.f32.mrf.mxu1 }
 0x48a   :  { %v2256_v2 = vadd.f32 %v2255_v57, %v2179_v5 }
 0x48b   :  { %v2956_v11 = vpop.f32.mrf.mxu0  ;;  %v2981_v20 = vpop.f32.mrf.mxu1 }
 0x48d   :  { %v2329_v27 = vpop.f32.mrf.mxu0 }
 0x48e   :  { %v2330_v49 = vadd.f32 %v2329_v27, %v2256_v2 }
 0x48f   :  { %v2966_v60 = vpop.f32.mrf.mxu0 }
 0x490   :  { %v2404_v9 = vadd.f32 %v2403_v19, %v2330_v49 }
 0x491   :  { %v2477_v36 = vpop.f32.mrf.mxu0 }
 0x492   :  { %v2478_v59 = vadd.f32 %v2477_v36, %v2404_v9 }
 0x493   :  { %v2976_v12 = vpop.f32.mrf.mxu0 }
 0x494   :  { %v2550_v34 = vadd.f32 %v2549_v6, %v2478_v59 }
 0x4ce   :  { %v2564_v29 = vpop.permute.xlu1 %2563 }
 0x4cf   :  { %3001 = vrcp.f32 %v2564_v29 }
 0x4d2   :  { %v2101_v32 = vpop.permute.xlu1 %2100 }
 0x4d3   :  { %v2103_v21 = vmul.f32 0.0, %v2101_v32 }
 0x4d5   :  { %v2553_v17 = vadd.f32 %v2550_v34, %v2103_v21 }
 0x4dc   :  { %v3002_v33 = vpop.eup %3001 }
 0x4dd   :  { %v2567_v45 = vmul.f32 %v3002_v33, %v2553_v17 }
 0x4df   :  { %2568 = vst [vmem:[#allocation14] sm:$0xff] %v2567_v45 }
 0x4e0   :  { %3094 = shalt.err (!%p3091_p10)
}
 0x4e1   :  { %2578 = dma.vmem_to_hbm [thread:$0]  %s2576_s3, 128, %s4143_s4, [#allocation8]  }
 0x4e2   :  { %3109 = dma.done.wait [#allocation8], 128  }
 0x4e3   :  { %3110 = vsyncadd [#allocation8], 4294967168 }
 0x4e4   :  { %2582 = vsyncpa [#allocation7], 1 }
 0x4e5   :  { %2583 = vsyncpa [#allocation10], 1 }
 0x4e6   :  { %2584 = vsyncpa [#allocation13], 1 }
 0x4e7   :  { %2585 = vsyncpa [#allocation8], 1 }

</bundles_post_ra>
